<compile_context>
chip_gen: v7x
topology: tpu7x:2x2x1
jax: 0.10.0
libtpu: 0.0.40
codegen_flags: <defaults>
</compile_context>

<pallas_src>
import functools

import jax
import jax.numpy as jnp
import numpy as np
from jax import lax
from jax.experimental import pallas as pl
from jax.experimental.pallas import tpu as pltpu

EMBED_DIM = 128          # D  (module default)
HIDDEN_DIM = EMBED_DIM // 2
NUM_REFINEMENT_STEPS = 3
N_CLASSES = 4            # N
K_SHOT = 4               # K  -> NK = 16 support samples per task
NUM_TASKS = 8            # T  batched episodes


def prototype_kernel(mask_ref, e_ref, p_ref, out_ref, *, num_steps, embed_dim, hidden_dim):
    """One grid step = one task. Every ref is a whole (tiny) VMEM block.

    mask_ref : [N, NK]    one-hot class membership (class-major)
    e_ref    : [NK, D]    support embeddings for this task
    p_ref    : [4D+8, D]  merged parameter blob (resident across the whole grid):
                 rows 0  :D   -> W1 packed [D, 2Dh]: lanes 0:Dh = W1p (prototype half),
                                 lanes Dh:2Dh = W1e (embedding half)
                 rows D  :2D  -> W3_top  (refinement L1 rows multiplying the prototype)
                 rows 2D :3D  -> W3_bot  (refinement L1 rows multiplying the weighted avg)
                 rows 3D :4D  -> W4      (refinement L2)
                 row  4D      -> b1 (lanes 0:Dh)
                 row  4D+1    -> w2 (lanes 0:Dh)   (attention L2 weight; b2 dropped)
                 row  4D+2    -> b3
                 row  4D+3    -> b4
    out_ref  : [N, D]     refined prototypes for this task
    """
    d, dh = embed_dim, hidden_dim
    r_w1, r_w3t, r_w3b, r_w4, r_vec = 0, d, 2 * d, 3 * d, 4 * d

    E = e_ref[...]                                    # [NK, D]
    Mt = mask_ref[...]                                # [N, NK]

    # ---- hoisted, step-independent work (one MXU pass each, per task) ----
    # initial prototypes = per-class means via one NK-contraction matmul
    cnt = jnp.sum(Mt, axis=-1, keepdims=True)                                       # [N, 1]
    P = jnp.dot(Mt, E, preferred_element_type=jnp.float32) / jnp.maximum(cnt, 1.0)  # [N, D]

    b1 = p_ref[r_vec:r_vec + 1, 0:dh]                                               # [1, Dh]
    w2 = p_ref[r_vec + 1:r_vec + 2, 0:dh]                                           # [1, Dh]
    b3 = p_ref[r_vec + 2:r_vec + 3, :]                                              # [1, D]
    b4 = p_ref[r_vec + 3:r_vec + 4, :]                                              # [1, D]

    # attention-L1 contribution of the (class-independent) embeddings: E @ W1e + b1.
    # Full-width [D, 2Dh] matmul, keep the embedding half (lanes Dh:2Dh of the result).
    A = jnp.dot(E, p_ref[r_w1:r_w1 + d, :],
                preferred_element_type=jnp.float32)[:, dh:2 * dh] + b1              # [NK, Dh]
    # E @ W3_bot, so each step's refinement input becomes  P @ W3_top + w @ EW3b
    EW3b = jnp.dot(E, p_ref[r_w3b:r_w3b + d, :],
                   preferred_element_type=jnp.float32)                              # [NK, D]

    valid = Mt > 0.0
    neg = jnp.float32(-1e30)

    for _ in range(num_steps):                        # static unroll, num_steps is tiny
        # attention L1 for all classes at once: H[c, i] = relu(A[i] + (P @ W1p)[c])
        B = jnp.dot(P, p_ref[r_w1:r_w1 + d, :],
                    preferred_element_type=jnp.float32)[:, 0:dh]                    # [N, Dh]
        H = jnp.maximum(A[None, :, :] + B[:, None, :], 0.0)                         # [N, NK, Dh]
        # attention L2 (out_features = 1); b2 dropped (softmax shift-invariant)
        s = jnp.sum(H * w2[None, :, :], axis=-1)                                    # [N, NK]
        # per-class masked softmax over each class's own support samples
        s = jnp.where(valid, s, neg)
        s = s - jnp.max(s, axis=-1, keepdims=True)
        ex = jnp.exp(s)
        w = ex / jnp.sum(ex, axis=-1, keepdims=True)                                # [N, NK]
        # refinement MLP (decomposed): relu(P@W3_top + w@(E@W3_bot) + b3) @ W4 + b4
        R = (jnp.dot(P, p_ref[r_w3t:r_w3t + d, :], preferred_element_type=jnp.float32)
             + jnp.dot(w, EW3b, preferred_element_type=jnp.float32)
             + b3)                                                                  # [N, D]
        R = jnp.maximum(R, 0.0)
        R = jnp.dot(R, p_ref[r_w4:r_w4 + d, :],
                    preferred_element_type=jnp.float32) + b4                        # [N, D]
        # F.normalize(p=2, dim=0, eps=1e-12): r / max(||r||, 1e-12)
        ss = jnp.sum(R * R, axis=-1, keepdims=True)
        P = R * lax.rsqrt(jnp.maximum(ss, 1e-24))

    out_ref[...] = P


@jax.jit
def prototype_forward(mask_t, embeddings, param_blob):
    """mask_t: [T, N, NK], embeddings: [T, NK, D], param_blob: [4D+8, D] -> [T, N, D]."""
    t, n, nk = mask_t.shape
    d = embeddings.shape[-1]
    dh = d // 2
    kernel = functools.partial(prototype_kernel, num_steps=NUM_REFINEMENT_STEPS,
                               embed_dim=d, hidden_dim=dh)
    return pl.pallas_call(
        kernel,
        out_shape=jax.ShapeDtypeStruct((t, n, d), jnp.float32),
        grid=(t,),
        in_specs=[
            pl.BlockSpec((None, n, nk), lambda i: (i, 0, 0)),          # per-task mask
            pl.BlockSpec((None, nk, d), lambda i: (i, 0, 0)),          # per-task embeddings
            pl.BlockSpec(param_blob.shape, lambda i: (0, 0)),          # weights: DMA'd once
        ],
        out_specs=pl.BlockSpec((None, n, d), lambda i: (i, 0, 0)),
        compiler_params=pltpu.CompilerParams(dimension_semantics=("parallel",)),
    )(mask_t, embeddings, param_blob)


def pack_params(params, d, dh):
    """Pack the 8 Linear parameters into one lane-dense [4D+8, D] f32 blob."""
    (w1_full, b1, w2, b2, w3_full, b3, w4, b4) = params
    del b2  # softmax is shift-invariant -> b2 has no effect on the output
    assert 2 * dh == d, "packing assumes hidden_dim == embed_dim // 2"
    w1e = w1_full[0:d, :]                      # [D, Dh]  multiplies support embeddings
    w1p = w1_full[d:2 * d, :]                  # [D, Dh]  multiplies the prototype
    w1_blk = jnp.concatenate([w1p, w1e], axis=1)          # [D, 2Dh] = [128, 128]
    w3_top = w3_full[0:d, :]                   # [D, D]
    w3_bot = w3_full[d:2 * d, :]               # [D, D]
    rows = 4 * d + 8                           # pad the 4 vector rows up to a sublane multiple
    blob = jnp.zeros((rows, d), jnp.float32)
    blob = blob.at[0:d, :].set(w1_blk)
    blob = blob.at[d:2 * d, :].set(w3_top)
    blob = blob.at[2 * d:3 * d, :].set(w3_bot)
    blob = blob.at[3 * d:4 * d, :].set(w4)
    blob = blob.at[4 * d, 0:dh].set(b1[0])
    blob = blob.at[4 * d + 1, 0:dh].set(w2[0])
    blob = blob.at[4 * d + 2, :].set(b3[0])
    blob = blob.at[4 * d + 3, :].set(b4[0])
    return blob


def reference_forward(embeddings, labels, params, n_classes, num_steps):
    """Pure-JAX replica of the PyTorch forward (eager, per-class boolean masks)."""
    (w1_full, b1, w2, b2, w3_full, b3, w4, b4) = params
    labels = np.asarray(labels)

    protos = []
    for c in range(n_classes):
        ce = embeddings[labels == c]
        protos.append(jnp.mean(ce, axis=0))
    P = jnp.stack(protos)

    for _ in range(num_steps):
        new_p = []
        for c in range(n_classes):
            ce = embeddings[labels == c]                           # [Kc, D]
            pe = jnp.broadcast_to(P[c], ce.shape)
            att_in = jnp.concatenate([ce, pe], axis=1)             # [Kc, 2D]
            h = jax.nn.relu(att_in @ w1_full + b1[0])
            s = h @ w2[0][:, None] + b2[0, 0]                      # [Kc, 1]
            w = jax.nn.softmax(s, axis=0)
            wavg = jnp.sum(w * ce, axis=0)                         # [D]
            ref_in = jnp.concatenate([P[c], wavg])                 # [2D]
            r = jax.nn.relu(ref_in @ w3_full + b3[0]) @ w4 + b4[0]
            r = r / jnp.maximum(jnp.linalg.norm(r), 1e-12)
            new_p.append(r)
        P = jnp.stack(new_p)
    return P


def init_params(key, d, dh):
    """Deterministic PyTorch-Linear-style init (uniform +/- 1/sqrt(fan_in)), transposed."""
    ks = jax.random.split(key, 8)

    def u(k, shape, fan_in):
        bound = 1.0 / np.sqrt(fan_in)
        return jax.random.uniform(k, shape, jnp.float32, -bound, bound)

    w1_full = u(ks[0], (2 * d, dh), 2 * d)       # attention Linear(2D -> D/2), transposed
    b1 = u(ks[1], (1, dh), 2 * d)
    w2 = u(ks[2], (1, dh), dh)                   # attention Linear(D/2 -> 1) weight row
    b2 = u(ks[3], (1, 1), dh)
    w3_full = u(ks[4], (2 * d, d), 2 * d)        # refinement Linear(2D -> D), transposed
    b3 = u(ks[5], (1, d), 2 * d)
    w4 = u(ks[6], (d, d), d)                     # refinement Linear(D -> D), transposed
    b4 = u(ks[7], (1, d), d)
    return (w1_full, b1, w2, b2, w3_full, b3, w4, b4)


if __name__ == "__main__":
    key = jax.random.PRNGKey(0)
    k_param, k_emb = jax.random.split(key)

    params = init_params(k_param, EMBED_DIM, HIDDEN_DIM)
    blob = pack_params(params, EMBED_DIM, HIDDEN_DIM)

    nk = N_CLASSES * K_SHOT
    embeddings = jax.random.normal(k_emb, (NUM_TASKS, nk, EMBED_DIM), dtype=jnp.float32)
    labels = jnp.tile(jnp.arange(N_CLASSES, dtype=jnp.int32), K_SHOT)                 # [NK]
    # class-major one-hot mask: mask[c, i] = 1 iff labels[i] == c  (same episode layout per task)
    mask = (jnp.arange(N_CLASSES)[:, None] == labels[None, :]).astype(jnp.float32)    # [N, NK]
    mask_t = jnp.broadcast_to(mask, (NUM_TASKS, N_CLASSES, nk))                       # [T, N, NK]

    out = prototype_forward(mask_t, embeddings, blob)
    out = jax.block_until_ready(out)

    ref = jnp.stack([
        reference_forward(embeddings[t], labels, params, N_CLASSES, NUM_REFINEMENT_STEPS)
        for t in range(NUM_TASKS)
    ])
    np.testing.assert_allclose(np.asarray(out), np.asarray(ref), rtol=2e-3, atol=2e-3)

    # TODO(synk): classes with zero support samples get uniform attention over all samples
    # instead of torch.unique's "class absent" behavior; not exercised by this episode layout.
    print("KERNEL_OK")
</pallas_src>

<mosaic_0001>
module attributes {stable_mosaic.version = 11 : i64} {
  func.func @prototype_kernel(%arg0: i32, %arg1: memref<1x4x16xf32, #tpu.memory_space<vmem>>, %arg2: memref<1x16x128xf32, #tpu.memory_space<vmem>>, %arg3: memref<520x128xf32, #tpu.memory_space<vmem>>, %arg4: memref<1x4x128xf32, #tpu.memory_space<vmem>>) attributes {dimension_semantics = [#tpu.dimension_semantics<parallel>], iteration_bounds = array<i64: 8>, scalar_prefetch = 0 : i64, scratch_operands = 0 : i64, tpu.core_type = #tpu.core_type<tc>, window_params = [{transform_indices = @transform_0, window_bounds = array<i64: 1, 4, 16>}, {transform_indices = @transform_1, window_bounds = array<i64: 1, 16, 128>}, {pipeline_mode = #tpu.pipeline_mode<synchronous>, transform_indices = @transform_2, window_bounds = array<i64: 520, 128>}, {transform_indices = @transform_3, window_bounds = array<i64: 1, 4, 128>}]} {
    %c0 = arith.constant 0 : index
    %c0_0 = arith.constant 0 : index
    %c0_1 = arith.constant 0 : index
    %0 = vector.load %arg2[%c0, %c0_0, %c0_1] : memref<1x16x128xf32, #tpu.memory_space<vmem>>, vector<1x16x128xf32>
    %1 = vector.shape_cast %0 : vector<1x16x128xf32> to vector<16x128xf32>
    %c0_2 = arith.constant 0 : index
    %c0_3 = arith.constant 0 : index
    %c0_4 = arith.constant 0 : index
    %2 = vector.load %arg1[%c0_2, %c0_3, %c0_4] : memref<1x4x16xf32, #tpu.memory_space<vmem>>, vector<1x4x16xf32>
    %3 = vector.shape_cast %2 : vector<1x4x16xf32> to vector<4x16xf32>
    %cst = arith.constant dense<0.000000e+00> : vector<4xf32>
    %4 = vector.multi_reduction <add>, %3, %cst [1] : vector<4x16xf32> to vector<4xf32>
    %5 = vector.shape_cast %4 : vector<4xf32> to vector<4x1xf32>
    %cst_5 = arith.constant dense<0.000000e+00> : vector<4x128xf32>
    %6 = tpu.matmul %3, %1, %cst_5 {dimension_numbers = #tpu.dot_dimension_numbers<[1], [0], [0], [1], [0, 0, 1, 1], [], []>} : vector<4x16xf32>, vector<16x128xf32>, vector<4x128xf32> -> vector<4x128xf32>
    %cst_6 = arith.constant 1.000000e+00 : f32
    %7 = vector.broadcast %cst_6 : f32 to vector<4x1xf32>
    %8 = arith.maximumf %5, %7 : vector<4x1xf32>
    %9 = vector.broadcast %8 : vector<4x1xf32> to vector<4x128xf32>
    %10 = arith.divf %6, %9 : vector<4x128xf32>
    %c512 = arith.constant 512 : index
    %c0_7 = arith.constant 0 : index
    %11 = vector.load %arg3[%c512, %c0_7] : memref<520x128xf32, #tpu.memory_space<vmem>>, vector<1x64xf32>
    %c513 = arith.constant 513 : index
    %c0_8 = arith.constant 0 : index
    %12 = vector.load %arg3[%c513, %c0_8] : memref<520x128xf32, #tpu.memory_space<vmem>>, vector<1x64xf32>
    %c514 = arith.constant 514 : index
    %c0_9 = arith.constant 0 : index
    %13 = vector.load %arg3[%c514, %c0_9] : memref<520x128xf32, #tpu.memory_space<vmem>>, vector<1x128xf32>
    %c515 = arith.constant 515 : index
    %c0_10 = arith.constant 0 : index
    %14 = vector.load %arg3[%c515, %c0_10] : memref<520x128xf32, #tpu.memory_space<vmem>>, vector<1x128xf32>
    %c0_11 = arith.constant 0 : index
    %c0_12 = arith.constant 0 : index
    %15 = vector.load %arg3[%c0_11, %c0_12] : memref<520x128xf32, #tpu.memory_space<vmem>>, vector<128x128xf32>
    %cst_13 = arith.constant dense<0.000000e+00> : vector<16x128xf32>
    %16 = tpu.matmul %1, %15, %cst_13 {dimension_numbers = #tpu.dot_dimension_numbers<[1], [0], [0], [1], [0, 0, 1, 1], [], []>} : vector<16x128xf32>, vector<128x128xf32>, vector<16x128xf32> -> vector<16x128xf32>
    %17 = vector.extract_strided_slice %16 {offsets = [0, 64], sizes = [16, 64], strides = [1, 1]} : vector<16x128xf32> to vector<16x64xf32>
    %18 = vector.broadcast %11 : vector<1x64xf32> to vector<16x64xf32>
    %19 = arith.addf %17, %18 : vector<16x64xf32>
    %c256 = arith.constant 256 : index
    %c0_14 = arith.constant 0 : index
    %20 = vector.load %arg3[%c256, %c0_14] : memref<520x128xf32, #tpu.memory_space<vmem>>, vector<128x128xf32>
    %cst_15 = arith.constant dense<0.000000e+00> : vector<16x128xf32>
    %21 = tpu.matmul %1, %20, %cst_15 {dimension_numbers = #tpu.dot_dimension_numbers<[1], [0], [0], [1], [0, 0, 1, 1], [], []>} : vector<16x128xf32>, vector<128x128xf32>, vector<16x128xf32> -> vector<16x128xf32>
    %cst_16 = arith.constant 0.000000e+00 : f32
    %22 = vector.broadcast %cst_16 : f32 to vector<4x16xf32>
    %23 = arith.cmpf ogt, %3, %22 : vector<4x16xf32>
    %c0_17 = arith.constant 0 : index
    %c0_18 = arith.constant 0 : index
    %24 = vector.load %arg3[%c0_17, %c0_18] : memref<520x128xf32, #tpu.memory_space<vmem>>, vector<128x128xf32>
    %cst_19 = arith.constant dense<0.000000e+00> : vector<4x128xf32>
    %25 = tpu.matmul %10, %24, %cst_19 {dimension_numbers = #tpu.dot_dimension_numbers<[1], [0], [0], [1], [0, 0, 1, 1], [], []>} : vector<4x128xf32>, vector<128x128xf32>, vector<4x128xf32> -> vector<4x128xf32>
    %26 = vector.extract_strided_slice %25 {offsets = [0, 0], sizes = [4, 64], strides = [1, 1]} : vector<4x128xf32> to vector<4x64xf32>
    %27 = vector.shape_cast %19 : vector<16x64xf32> to vector<1x16x64xf32>
    %28 = vector.shape_cast %26 : vector<4x64xf32> to vector<4x1x64xf32>
    %29 = vector.broadcast %27 : vector<1x16x64xf32> to vector<4x16x64xf32>
    %30 = vector.broadcast %28 : vector<4x1x64xf32> to vector<4x16x64xf32>
    %31 = arith.addf %29, %30 : vector<4x16x64xf32>
    %cst_20 = arith.constant 0.000000e+00 : f32
    %32 = vector.broadcast %cst_20 : f32 to vector<4x16x64xf32>
    %33 = arith.maximumf %31, %32 : vector<4x16x64xf32>
    %34 = vector.shape_cast %12 : vector<1x64xf32> to vector<1x1x64xf32>
    %35 = vector.broadcast %34 : vector<1x1x64xf32> to vector<4x16x64xf32>
    %36 = arith.mulf %33, %35 : vector<4x16x64xf32>
    %cst_21 = arith.constant dense<0.000000e+00> : vector<4x16xf32>
    %37 = vector.multi_reduction <add>, %36, %cst_21 [2] : vector<4x16x64xf32> to vector<4x16xf32>
    %cst_22 = arith.constant -1.000000e+30 : f32
    %38 = vector.broadcast %cst_22 : f32 to vector<4x16xf32>
    %39 = arith.select %23, %37, %38 : vector<4x16xi1>, vector<4x16xf32>
    %cst_23 = arith.constant dense<0xFF800000> : vector<4xf32>
    %40 = vector.multi_reduction <maximumf>, %39, %cst_23 [1] : vector<4x16xf32> to vector<4xf32>
    %41 = vector.shape_cast %40 : vector<4xf32> to vector<4x1xf32>
    %42 = vector.broadcast %41 : vector<4x1xf32> to vector<4x16xf32>
    %43 = arith.subf %39, %42 : vector<4x16xf32>
    %44 = math.exp %43 : vector<4x16xf32>
    %cst_24 = arith.constant dense<0.000000e+00> : vector<4xf32>
    %45 = vector.multi_reduction <add>, %44, %cst_24 [1] : vector<4x16xf32> to vector<4xf32>
    %46 = vector.shape_cast %45 : vector<4xf32> to vector<4x1xf32>
    %47 = vector.broadcast %46 : vector<4x1xf32> to vector<4x16xf32>
    %48 = arith.divf %44, %47 : vector<4x16xf32>
    %c128 = arith.constant 128 : index
    %c0_25 = arith.constant 0 : index
    %49 = vector.load %arg3[%c128, %c0_25] : memref<520x128xf32, #tpu.memory_space<vmem>>, vector<128x128xf32>
    %cst_26 = arith.constant dense<0.000000e+00> : vector<4x128xf32>
    %50 = tpu.matmul %10, %49, %cst_26 {dimension_numbers = #tpu.dot_dimension_numbers<[1], [0], [0], [1], [0, 0, 1, 1], [], []>} : vector<4x128xf32>, vector<128x128xf32>, vector<4x128xf32> -> vector<4x128xf32>
    %cst_27 = arith.constant dense<0.000000e+00> : vector<4x128xf32>
    %51 = tpu.matmul %48, %21, %cst_27 {dimension_numbers = #tpu.dot_dimension_numbers<[1], [0], [0], [1], [0, 0, 1, 1], [], []>} : vector<4x16xf32>, vector<16x128xf32>, vector<4x128xf32> -> vector<4x128xf32>
    %52 = arith.addf %50, %51 : vector<4x128xf32>
    %53 = vector.broadcast %13 : vector<1x128xf32> to vector<4x128xf32>
    %54 = arith.addf %52, %53 : vector<4x128xf32>
    %cst_28 = arith.constant 0.000000e+00 : f32
    %55 = vector.broadcast %cst_28 : f32 to vector<4x128xf32>
    %56 = arith.maximumf %54, %55 : vector<4x128xf32>
    %c384 = arith.constant 384 : index
    %c0_29 = arith.constant 0 : index
    %57 = vector.load %arg3[%c384, %c0_29] : memref<520x128xf32, #tpu.memory_space<vmem>>, vector<128x128xf32>
    %cst_30 = arith.constant dense<0.000000e+00> : vector<4x128xf32>
    %58 = tpu.matmul %56, %57, %cst_30 {dimension_numbers = #tpu.dot_dimension_numbers<[1], [0], [0], [1], [0, 0, 1, 1], [], []>} : vector<4x128xf32>, vector<128x128xf32>, vector<4x128xf32> -> vector<4x128xf32>
    %59 = vector.broadcast %14 : vector<1x128xf32> to vector<4x128xf32>
    %60 = arith.addf %58, %59 : vector<4x128xf32>
    %61 = arith.mulf %60, %60 : vector<4x128xf32>
    %cst_31 = arith.constant dense<0.000000e+00> : vector<4xf32>
    %62 = vector.multi_reduction <add>, %61, %cst_31 [1] : vector<4x128xf32> to vector<4xf32>
    %63 = vector.shape_cast %62 : vector<4xf32> to vector<4x1xf32>
    %cst_32 = arith.constant 1.000000e-24 : f32
    %64 = vector.broadcast %cst_32 : f32 to vector<4x1xf32>
    %65 = arith.maximumf %63, %64 : vector<4x1xf32>
    %66 = math.rsqrt %65 : vector<4x1xf32>
    %67 = vector.broadcast %66 : vector<4x1xf32> to vector<4x128xf32>
    %68 = arith.mulf %60, %67 : vector<4x128xf32>
    %c0_33 = arith.constant 0 : index
    %c0_34 = arith.constant 0 : index
    %69 = vector.load %arg3[%c0_33, %c0_34] : memref<520x128xf32, #tpu.memory_space<vmem>>, vector<128x128xf32>
    %cst_35 = arith.constant dense<0.000000e+00> : vector<4x128xf32>
    %70 = tpu.matmul %68, %69, %cst_35 {dimension_numbers = #tpu.dot_dimension_numbers<[1], [0], [0], [1], [0, 0, 1, 1], [], []>} : vector<4x128xf32>, vector<128x128xf32>, vector<4x128xf32> -> vector<4x128xf32>
    %71 = vector.extract_strided_slice %70 {offsets = [0, 0], sizes = [4, 64], strides = [1, 1]} : vector<4x128xf32> to vector<4x64xf32>
    %72 = vector.shape_cast %19 : vector<16x64xf32> to vector<1x16x64xf32>
    %73 = vector.shape_cast %71 : vector<4x64xf32> to vector<4x1x64xf32>
    %74 = vector.broadcast %72 : vector<1x16x64xf32> to vector<4x16x64xf32>
    %75 = vector.broadcast %73 : vector<4x1x64xf32> to vector<4x16x64xf32>
    %76 = arith.addf %74, %75 : vector<4x16x64xf32>
    %cst_36 = arith.constant 0.000000e+00 : f32
    %77 = vector.broadcast %cst_36 : f32 to vector<4x16x64xf32>
    %78 = arith.maximumf %76, %77 : vector<4x16x64xf32>
    %79 = vector.shape_cast %12 : vector<1x64xf32> to vector<1x1x64xf32>
    %80 = vector.broadcast %79 : vector<1x1x64xf32> to vector<4x16x64xf32>
    %81 = arith.mulf %78, %80 : vector<4x16x64xf32>
    %cst_37 = arith.constant dense<0.000000e+00> : vector<4x16xf32>
    %82 = vector.multi_reduction <add>, %81, %cst_37 [2] : vector<4x16x64xf32> to vector<4x16xf32>
    %cst_38 = arith.constant -1.000000e+30 : f32
    %83 = vector.broadcast %cst_38 : f32 to vector<4x16xf32>
    %84 = arith.select %23, %82, %83 : vector<4x16xi1>, vector<4x16xf32>
    %cst_39 = arith.constant dense<0xFF800000> : vector<4xf32>
    %85 = vector.multi_reduction <maximumf>, %84, %cst_39 [1] : vector<4x16xf32> to vector<4xf32>
    %86 = vector.shape_cast %85 : vector<4xf32> to vector<4x1xf32>
    %87 = vector.broadcast %86 : vector<4x1xf32> to vector<4x16xf32>
    %88 = arith.subf %84, %87 : vector<4x16xf32>
    %89 = math.exp %88 : vector<4x16xf32>
    %cst_40 = arith.constant dense<0.000000e+00> : vector<4xf32>
    %90 = vector.multi_reduction <add>, %89, %cst_40 [1] : vector<4x16xf32> to vector<4xf32>
    %91 = vector.shape_cast %90 : vector<4xf32> to vector<4x1xf32>
    %92 = vector.broadcast %91 : vector<4x1xf32> to vector<4x16xf32>
    %93 = arith.divf %89, %92 : vector<4x16xf32>
    %c128_41 = arith.constant 128 : index
    %c0_42 = arith.constant 0 : index
    %94 = vector.load %arg3[%c128_41, %c0_42] : memref<520x128xf32, #tpu.memory_space<vmem>>, vector<128x128xf32>
    %cst_43 = arith.constant dense<0.000000e+00> : vector<4x128xf32>
    %95 = tpu.matmul %68, %94, %cst_43 {dimension_numbers = #tpu.dot_dimension_numbers<[1], [0], [0], [1], [0, 0, 1, 1], [], []>} : vector<4x128xf32>, vector<128x128xf32>, vector<4x128xf32> -> vector<4x128xf32>
    %cst_44 = arith.constant dense<0.000000e+00> : vector<4x128xf32>
    %96 = tpu.matmul %93, %21, %cst_44 {dimension_numbers = #tpu.dot_dimension_numbers<[1], [0], [0], [1], [0, 0, 1, 1], [], []>} : vector<4x16xf32>, vector<16x128xf32>, vector<4x128xf32> -> vector<4x128xf32>
    %97 = arith.addf %95, %96 : vector<4x128xf32>
    %98 = vector.broadcast %13 : vector<1x128xf32> to vector<4x128xf32>
    %99 = arith.addf %97, %98 : vector<4x128xf32>
    %cst_45 = arith.constant 0.000000e+00 : f32
    %100 = vector.broadcast %cst_45 : f32 to vector<4x128xf32>
    %101 = arith.maximumf %99, %100 : vector<4x128xf32>
    %c384_46 = arith.constant 384 : index
    %c0_47 = arith.constant 0 : index
    %102 = vector.load %arg3[%c384_46, %c0_47] : memref<520x128xf32, #tpu.memory_space<vmem>>, vector<128x128xf32>
    %cst_48 = arith.constant dense<0.000000e+00> : vector<4x128xf32>
    %103 = tpu.matmul %101, %102, %cst_48 {dimension_numbers = #tpu.dot_dimension_numbers<[1], [0], [0], [1], [0, 0, 1, 1], [], []>} : vector<4x128xf32>, vector<128x128xf32>, vector<4x128xf32> -> vector<4x128xf32>
    %104 = vector.broadcast %14 : vector<1x128xf32> to vector<4x128xf32>
    %105 = arith.addf %103, %104 : vector<4x128xf32>
    %106 = arith.mulf %105, %105 : vector<4x128xf32>
    %cst_49 = arith.constant dense<0.000000e+00> : vector<4xf32>
    %107 = vector.multi_reduction <add>, %106, %cst_49 [1] : vector<4x128xf32> to vector<4xf32>
    %108 = vector.shape_cast %107 : vector<4xf32> to vector<4x1xf32>
    %cst_50 = arith.constant 1.000000e-24 : f32
    %109 = vector.broadcast %cst_50 : f32 to vector<4x1xf32>
    %110 = arith.maximumf %108, %109 : vector<4x1xf32>
    %111 = math.rsqrt %110 : vector<4x1xf32>
    %112 = vector.broadcast %111 : vector<4x1xf32> to vector<4x128xf32>
    %113 = arith.mulf %105, %112 : vector<4x128xf32>
    %c0_51 = arith.constant 0 : index
    %c0_52 = arith.constant 0 : index
    %114 = vector.load %arg3[%c0_51, %c0_52] : memref<520x128xf32, #tpu.memory_space<vmem>>, vector<128x128xf32>
    %cst_53 = arith.constant dense<0.000000e+00> : vector<4x128xf32>
    %115 = tpu.matmul %113, %114, %cst_53 {dimension_numbers = #tpu.dot_dimension_numbers<[1], [0], [0], [1], [0, 0, 1, 1], [], []>} : vector<4x128xf32>, vector<128x128xf32>, vector<4x128xf32> -> vector<4x128xf32>
    %116 = vector.extract_strided_slice %115 {offsets = [0, 0], sizes = [4, 64], strides = [1, 1]} : vector<4x128xf32> to vector<4x64xf32>
    %117 = vector.shape_cast %19 : vector<16x64xf32> to vector<1x16x64xf32>
    %118 = vector.shape_cast %116 : vector<4x64xf32> to vector<4x1x64xf32>
    %119 = vector.broadcast %117 : vector<1x16x64xf32> to vector<4x16x64xf32>
    %120 = vector.broadcast %118 : vector<4x1x64xf32> to vector<4x16x64xf32>
    %121 = arith.addf %119, %120 : vector<4x16x64xf32>
    %cst_54 = arith.constant 0.000000e+00 : f32
    %122 = vector.broadcast %cst_54 : f32 to vector<4x16x64xf32>
    %123 = arith.maximumf %121, %122 : vector<4x16x64xf32>
    %124 = vector.shape_cast %12 : vector<1x64xf32> to vector<1x1x64xf32>
    %125 = vector.broadcast %124 : vector<1x1x64xf32> to vector<4x16x64xf32>
    %126 = arith.mulf %123, %125 : vector<4x16x64xf32>
    %cst_55 = arith.constant dense<0.000000e+00> : vector<4x16xf32>
    %127 = vector.multi_reduction <add>, %126, %cst_55 [2] : vector<4x16x64xf32> to vector<4x16xf32>
    %cst_56 = arith.constant -1.000000e+30 : f32
    %128 = vector.broadcast %cst_56 : f32 to vector<4x16xf32>
    %129 = arith.select %23, %127, %128 : vector<4x16xi1>, vector<4x16xf32>
    %cst_57 = arith.constant dense<0xFF800000> : vector<4xf32>
    %130 = vector.multi_reduction <maximumf>, %129, %cst_57 [1] : vector<4x16xf32> to vector<4xf32>
    %131 = vector.shape_cast %130 : vector<4xf32> to vector<4x1xf32>
    %132 = vector.broadcast %131 : vector<4x1xf32> to vector<4x16xf32>
    %133 = arith.subf %129, %132 : vector<4x16xf32>
    %134 = math.exp %133 : vector<4x16xf32>
    %cst_58 = arith.constant dense<0.000000e+00> : vector<4xf32>
    %135 = vector.multi_reduction <add>, %134, %cst_58 [1] : vector<4x16xf32> to vector<4xf32>
    %136 = vector.shape_cast %135 : vector<4xf32> to vector<4x1xf32>
    %137 = vector.broadcast %136 : vector<4x1xf32> to vector<4x16xf32>
    %138 = arith.divf %134, %137 : vector<4x16xf32>
    %c128_59 = arith.constant 128 : index
    %c0_60 = arith.constant 0 : index
    %139 = vector.load %arg3[%c128_59, %c0_60] : memref<520x128xf32, #tpu.memory_space<vmem>>, vector<128x128xf32>
    %cst_61 = arith.constant dense<0.000000e+00> : vector<4x128xf32>
    %140 = tpu.matmul %113, %139, %cst_61 {dimension_numbers = #tpu.dot_dimension_numbers<[1], [0], [0], [1], [0, 0, 1, 1], [], []>} : vector<4x128xf32>, vector<128x128xf32>, vector<4x128xf32> -> vector<4x128xf32>
    %cst_62 = arith.constant dense<0.000000e+00> : vector<4x128xf32>
    %141 = tpu.matmul %138, %21, %cst_62 {dimension_numbers = #tpu.dot_dimension_numbers<[1], [0], [0], [1], [0, 0, 1, 1], [], []>} : vector<4x16xf32>, vector<16x128xf32>, vector<4x128xf32> -> vector<4x128xf32>
    %142 = arith.addf %140, %141 : vector<4x128xf32>
    %143 = vector.broadcast %13 : vector<1x128xf32> to vector<4x128xf32>
    %144 = arith.addf %142, %143 : vector<4x128xf32>
    %cst_63 = arith.constant 0.000000e+00 : f32
    %145 = vector.broadcast %cst_63 : f32 to vector<4x128xf32>
    %146 = arith.maximumf %144, %145 : vector<4x128xf32>
    %c384_64 = arith.constant 384 : index
    %c0_65 = arith.constant 0 : index
    %147 = vector.load %arg3[%c384_64, %c0_65] : memref<520x128xf32, #tpu.memory_space<vmem>>, vector<128x128xf32>
    %cst_66 = arith.constant dense<0.000000e+00> : vector<4x128xf32>
    %148 = tpu.matmul %146, %147, %cst_66 {dimension_numbers = #tpu.dot_dimension_numbers<[1], [0], [0], [1], [0, 0, 1, 1], [], []>} : vector<4x128xf32>, vector<128x128xf32>, vector<4x128xf32> -> vector<4x128xf32>
    %149 = vector.broadcast %14 : vector<1x128xf32> to vector<4x128xf32>
    %150 = arith.addf %148, %149 : vector<4x128xf32>
    %151 = arith.mulf %150, %150 : vector<4x128xf32>
    %cst_67 = arith.constant dense<0.000000e+00> : vector<4xf32>
    %152 = vector.multi_reduction <add>, %151, %cst_67 [1] : vector<4x128xf32> to vector<4xf32>
    %153 = vector.shape_cast %152 : vector<4xf32> to vector<4x1xf32>
    %cst_68 = arith.constant 1.000000e-24 : f32
    %154 = vector.broadcast %cst_68 : f32 to vector<4x1xf32>
    %155 = arith.maximumf %153, %154 : vector<4x1xf32>
    %156 = math.rsqrt %155 : vector<4x1xf32>
    %157 = vector.broadcast %156 : vector<4x1xf32> to vector<4x128xf32>
    %158 = arith.mulf %150, %157 : vector<4x128xf32>
    %c0_69 = arith.constant 0 : index
    %c0_70 = arith.constant 0 : index
    %c0_71 = arith.constant 0 : index
    %159 = vector.load %arg4[%c0_69, %c0_70, %c0_71] : memref<1x4x128xf32, #tpu.memory_space<vmem>>, vector<1x4x128xf32>
    %160 = vector.shape_cast %159 : vector<1x4x128xf32> to vector<4x128xf32>
    %161 = vector.shape_cast %158 : vector<4x128xf32> to vector<1x4x128xf32>
    tpu.vector_store %arg4[%c0_69, %c0_70, %c0_71], %161 {strides = array<i32>} : memref<1x4x128xf32, #tpu.memory_space<vmem>>, vector<1x4x128xf32>,
    return
  }
  func.func @transform_0(%arg0: i32) -> (i32, i32, i32) {
    %c0_i32 = arith.constant 0 : i32
    %c0_i32_0 = arith.constant 0 : i32
    %c0_i32_1 = arith.constant 0 : i32
    return %arg0, %c0_i32, %c0_i32_0 : i32, i32, i32
  }
  func.func @transform_1(%arg0: i32) -> (i32, i32, i32) {
    %c0_i32 = arith.constant 0 : i32
    %c0_i32_0 = arith.constant 0 : i32
    %c0_i32_1 = arith.constant 0 : i32
    return %arg0, %c0_i32, %c0_i32_0 : i32, i32, i32
  }
  func.func @transform_2(%arg0: i32) -> (i32, i32) {
    %c0_i32 = arith.constant 0 : i32
    %c0_i32_0 = arith.constant 0 : i32
    %c0_i32_1 = arith.constant 0 : i32
    return %c0_i32, %c0_i32_0 : i32, i32
  }
  func.func @transform_3(%arg0: i32) -> (i32, i32, i32) {
    %c0_i32 = arith.constant 0 : i32
    %c0_i32_0 = arith.constant 0 : i32
    %c0_i32_1 = arith.constant 0 : i32
    return %arg0, %c0_i32, %c0_i32_0 : i32, i32, i32
  }
}

</mosaic_0001>

<bundles_post_ra>
// kernel: prototype_forward.1
= control target key start
LH: loop header
LB: loop body
LE: loop exit
PB: predicated region body
PF: predicated region fallthrough
CT: control target
= control target key end

     0   :  { %8 = vsyncpa [#allocation3], 0  ;;  %s4096_s0 = inlined_call_operand.hbm [shape: f32[8,4,16], index: 0, kind: input, shape index: {}]   ;;  %s4097_s1 = inlined_call_operand.hbm [shape: f32[8,16,128], index: 1, kind: input, shape index: {}]   ;;  %s4098_s2 = inlined_call_operand.hbm [shape: f32[520,128], index: 2, kind: input, shape index: {}]   ;;  %s4099_s3 = inlined_call_operand.hbm [shape: f32[8,4,128], index: 3, kind: output, shape index: {}]  }
   0x1   :  { %10 = vsyncpa [#allocation3 + $0x1], 0 }
   0x2   :  { %11 = vsyncpa [#allocation6], 0 }
   0x3   :  { %13 = vsyncpa [#allocation6 + $0x1], 0 }
   0x4   :  { %14 = vsyncpa [#allocation4], 0 }
   0x5   :  { %16 = vsyncpa [#allocation4 + $0x1], 0  ;;  %s3367_s12 = smov 0   ;;  %s3369_s13 = smov 0  }
   0x6   :  { %s3371_s14 = smov 0   ;;  %s3373_s15 = smov 0  }
   0x7 LB: > { %s3388_s16 = sadd.s32 4294967295, %s3334_s15   ;;  %s2150_s17 = sadd.s32 4294967294, %s3334_s15   ;;  %s3334_s15 = sphi %s3373_s15, %s4120_s15   ;;  %s3330_s14 = sphi %s3371_s14, %s4119_s14   ;;  %s3326_s13 = sphi %s3369_s13, %s4118_s13   ;;  %s3322_s12 = sphi %s3367_s12, %s4117_s12  }
   0x8   : > { %p42_p0 = scmp.ne.s32.totalorder %s3326_s13, %s3322_s12  ;;  %p4100_p1 = scmp.eq.s32.totalorder %s3388_s16, 0 }
   0x9   : > { %p119_p3 = scmp.eq.s32.totalorder %s2150_s17, 7  ;;  %p2151_p5 = scmp.ge.s32.totalorder %s3334_s15, 1 }
   0xa   : > { %p3397_p4 = por %p4100_p1, %p42_p0  ;;  %p126_p7 = scmp.lt.s32.totalorder %s3334_s15, 9 }
   0xb   : > { %p3402_p6 = por %p119_p3, %p42_p0  ;;  %s3336_s21 = smov [#allocation7]  }
   0xc   : > { %s4104_s18 = scalar_select %p3397_p4, 1, 0 }
   0xd   : > { %s4105_s19 = scalar_select %p3402_p6, 1, 0 }
   0xe   : > { %p3407_p8 = pnand %p2151_p5, %p126_p7  ;;  %s138_s22 = sshll.u32 %s3336_s21, 4  ;;  %s139_s22 = int_to_ptr.vmem [resolvable:$true] %s138_s22 }
   0xf   : > { %s3420_s24 = sadd.s32 1, %s3334_s15   ;;  %s29_s25 = sadd.s32 1, %s3330_s14 }
  0x10   : > { %s4106_s20 = scalar_select %p3407_p8, 1, 0 }
  0x11   : > { %p3093_p9 = pneg %p3407_p8  ;;  %s26_s26 = ssub.s32 %s3334_s15, %s3420_s24 }
  0x12   : > { %s3172_s29 = scalar_lea.hbm %s4098_s2, 8320 }
  0x13   : > { %p3415_p10 = pnand %p3093_p9, %p4100_p1  ;;  %p3173_p11 = scmp.ne.s32.totalorder %s4098_s2, %s3172_s29 }
  0x14   : > { %p3179_p3 = scmp.lt.u32.totalorder %s3172_s29, %s4098_s2 }
  0x15   : > { %p3174_p12 = pneg %p3415_p10 }
  0x17   : > { %p3175_p13 = pnand %p3174_p12, %p3173_p11 }
  0x19   : > { %p3176_p0 = pneg %p3175_p13 }
  0x1b   : > { %p3181_p5 = pnand %p3179_p3, %p3176_p0 }
  0x1d   : > { %3184 = shalt.err (!%p3181_p5)
}
  0x1e   : > { %s3185_s7 = scalar_lea.vmem %s139_s22, 8320  ;;  %p3193_p2 = scmp.lt.s32.totalorder %s139_s22, %s139_s22 }
  0x1f   : > { %p3186_p7 = scmp.ne.s32.totalorder %s139_s22, %s3185_s7  ;;  %p3194_p6 = scmp.lt.s32.totalorder %s3185_s7, %s3185_s7 }
  0x21   : > { %p3188_p9 = pnand %p3186_p7, %p3174_p12  ;;  %p3195_p4 = por %p3194_p6, %p3193_p2 }
  0x23   : > { %p3189_p1 = pneg %p3188_p9 }
  0x25   : > { %p3196_p8 = pnand %p3195_p4, %p3189_p1 }
  0x27   : > { %3199 = shalt.err (!%p3196_p8)
}
  0x28   : > { %s4103_s8 = smov 128   ;;  %s3338_s9 = smov 8  }
  0x29   : > { %3096 = dma.hbm_to_vmem [thread:$0]  (!%p3415_p10), %s4098_s2, 8320, %s139_s22, [#allocation6], %s4103_s8, %s4103_s8, %s3338_s9  }
  0x2a   : > { %p27_p1 = scmp.eq.s32.totalorder %s26_s26, 0  ;;  %p36_p2 = scmp.ne.s32.totalorder %s3330_s14, %s3326_s13 }
  0x2b   : > { %p37_p4 = scmp.eq.s32.totalorder %s3334_s15, 0  ;;  %p3109_p6 = scmp.lt.s32.totalorder %s3334_s15, 8 }
  0x2c   : > { %s3449_s17 = scalar_select %p27_p1, %s3330_s14, %s29_s25  }
  0x2d   : > { %p38_p8 = por %p37_p4, %p36_p2  ;;  %p4108_p11 = scmp.eq.s32.totalorder %s3388_s16, 7 }
  0x2e   : > { %s3458_s23 = sand.u32 1, %s3330_s14   ;;  %s2155_s27 = sshll.u32 %s3334_s15, 6 }
  0x2f   : > { %p3453_p12 = por %p4108_p11, %p36_p2  ;;  %s2154_s28 = sshll.u32 %s3458_s23, 2 }
  0x30   : > { %s3465_s29 = scalar_lea.hbm %s4096_s0, %s2155_s27  ;;  %s156_s25 = scalar_lea.vmem [#allocation2], %s2154_s28 }
  0x31   : > { %s163_s30 = sshll.u32 %s156_s25, 4  ;;  %p3467_p10 = pnand %p3109_p6, %p38_p8  ;;  %s3471_s30 = int_to_ptr.vmem [resolvable:$true] %s163_s30 }
  0x32   : > { %s2156_s5 = sshll.u32 %s3458_s23, 4  ;;  %s153_s6 = scalar_lea.sflag [#allocation3], %s3458_s23 }
  0x33   : > { %s3200_s7 = scalar_lea.hbm %s3465_s29, 64  ;;  %p3202_p0 = pneg %p3467_p10 }
  0x34   : > { %p3201_p13 = scmp.ne.s32.totalorder %s3465_s29, %s3200_s7  ;;  %s3205_s27 = scalar_lea.hbm %s4096_s0, 512 }
  0x35   : > { %p3206_p7 = scmp.lt.u32.totalorder %s3465_s29, %s4096_s0  ;;  %p3207_p9 = scmp.lt.u32.totalorder %s3205_s27, %s3200_s7 }
  0x36   : > { %p3203_p3 = pnand %p3202_p0, %p3201_p13  ;;  %p3209_p2 = scmp.lt.u32.totalorder %s3200_s7, %s3465_s29 }
  0x37   : > { %p3208_p1 = por %p3207_p9, %p3206_p7 }
  0x38   : > { %p3204_p5 = pneg %p3203_p3 }
  0x39   : > { %p3210_p4 = por %p3209_p2, %p3208_p1 }
  0x3b   : > { %p3211_p6 = pnand %p3210_p4, %p3204_p5 }
  0x3d   : > { %3214 = shalt.err (!%p3211_p6)
}
  0x3e   : > { %s3215_s26 = scalar_lea.vmem %s3471_s30, 64  ;;  %s3339_s25 = smov [#allocation2]  }
  0x3f   : > { %p3216_p8 = scmp.ne.s32.totalorder %s3471_s30, %s3215_s26  ;;  %s3220_s10 = sshll.u32 %s3339_s25, 4  ;;  %s3221_s10 = int_to_ptr.vmem [resolvable:$false] %s3220_s10 }
  0x40   : > { %s3222_s11 = scalar_lea.vmem %s3221_s10, 128  ;;  %p3223_p3 = scmp.lt.s32.totalorder %s3471_s30, %s3221_s10 }
  0x41   : > { %p3218_p11 = pnand %p3216_p8, %p3202_p0  ;;  %p3224_p7 = scmp.lt.s32.totalorder %s3222_s11, %s3215_s26 }
  0x43   : > { %p3219_p13 = pneg %p3218_p11  ;;  %p3225_p9 = por %p3224_p7, %p3223_p3 }
  0x45   : > { %p3226_p1 = pnand %p3225_p9, %p3219_p13 }
  0x47   : > { %3229 = shalt.err (!%p3226_p1)
}
  0x48   : > { %3100 = dma.hbm_to_vmem [thread:$0]  (!%p3467_p10), %s3465_s29, 64, %s3471_s30, %s153_s6  }
  0x49   : > { %s174_s7 = scalar_lea.vmem [#allocation5], %s2156_s5  ;;  %s170_s28 = sand.u32 1, %s3334_s15  }
  0x4a   : > { %s181_s27 = sshll.u32 %s174_s7, 4  ;;  %s2176_s22 = sshll.u32 %s3334_s15, 8  ;;  %s3503_s27 = int_to_ptr.vmem [resolvable:$true] %s181_s27 }
  0x4b   : > { %s3509_s10 = scalar_lea.hbm %s4097_s1, %s2176_s22  ;;  %s3511_s11 = scalar_lea.sflag [#allocation6], %s170_s28 }
  0x4c   : > { %s3230_s8 = scalar_lea.hbm %s3509_s10, 256  ;;  %s3235_s30 = scalar_lea.hbm %s4097_s1, 2048 }
  0x4d   : > { %p3231_p5 = scmp.ne.s32.totalorder %s3509_s10, %s3230_s8  ;;  %p3236_p6 = scmp.lt.u32.totalorder %s3509_s10, %s4097_s1 }
  0x4e   : > { %p3237_p8 = scmp.lt.u32.totalorder %s3235_s30, %s3230_s8  ;;  %p3239_p13 = scmp.lt.u32.totalorder %s3230_s8, %s3509_s10 }
  0x4f   : > { %p3233_p2 = pnand %p3231_p5, %p3202_p0 }
  0x50   : > { %p3238_p11 = por %p3237_p8, %p3236_p6 }
  0x51   : > { %p3234_p4 = pneg %p3233_p2 }
  0x52   : > { %p3240_p3 = por %p3239_p13, %p3238_p11 }
  0x54   : > { %p3241_p7 = pnand %p3240_p3, %p3234_p4 }
  0x56   : > { %3244 = shalt.err (!%p3241_p7)
}
  0x57   : > { %s3245_s7 = scalar_lea.vmem %s3503_s27, 256  ;;  %s3340_s28 = smov [#allocation5]  }
  0x58   : > { %p3246_p9 = scmp.ne.s32.totalorder %s3503_s27, %s3245_s7  ;;  %s3250_s22 = sshll.u32 %s3340_s28, 4  ;;  %s3251_s22 = int_to_ptr.vmem [resolvable:$false] %s3250_s22 }
  0x59   : > { %s3252_s26 = scalar_lea.vmem %s3251_s22, 512  ;;  %p3253_p2 = scmp.lt.s32.totalorder %s3503_s27, %s3251_s22 }
  0x5a   : > { %p3248_p1 = pnand %p3246_p9, %p3202_p0  ;;  %p3254_p6 = scmp.lt.s32.totalorder %s3252_s26, %s3245_s7 }
  0x5c   : > { %p3249_p5 = pneg %p3248_p1  ;;  %p3255_p8 = por %p3254_p6, %p3253_p2 }
  0x5e   : > { %p3256_p11 = pnand %p3255_p8, %p3249_p5 }
  0x60   : > { %3259 = shalt.err (!%p3256_p11)
}
  0x61   : > { %s4111_s8 = smov 128   ;;  %p4112_p0 = scmp.ne.s32.totalorder %s4106_s20, 0 }
  0x62   : > { %3103 = dma.hbm_to_vmem [thread:$0]  (!%p3467_p10), %s3509_s10, 256, %s3503_s27, %s3511_s11, %s4111_s8, %s4111_s8, %s3338_s9  }
  0x63   : > { %193 = sbr.rel (%p4112_p0) target bundleno = 4992 (0x1380), region = 32  ;;  %s3543_s25 = sand.u32 (!%p4112_p0), 1, %s3326_s13  }
  0x64   : > { %s2160_s23 = sshll.u32 (!%p4112_p0), %s3543_s25, 2  ;;  %s196_s29 = scalar_lea.sflag (!%p4112_p0), [#allocation3], %s3543_s25 }
  0x65   : > { %s199_s4 = scalar_lea.vmem (!%p4112_p0), [#allocation2], %s2160_s23  ;;  %p4113_p4 = scmp.ne.s32.totalorder (!%p4112_p0), %s4104_s18, 0 }
  0x6a   : > { %3305 = dma.done.wait (%p4113_p4), %s196_s29, 64  }
  0x6b   : > { %3307 = vsyncadd (%p4113_p4), %s196_s29, 4294967232  ;;  %s204_s20 = sand.u32 1, %s3388_s16   ;;  %s2161_s9 = sshll.u32 %s3543_s25, 4 }
  0x6c   : > { %s205_s27 = scalar_lea.sflag [#allocation6], %s204_s20  ;;  %s208_s10 = scalar_lea.vmem [#allocation5], %s2161_s9 }
  0x6d   : > { %3309 = dma.done.wait (%p4113_p4), %s205_s27, 256  }
  0x6e   : > { %3311 = vsyncadd (%p4113_p4), %s205_s27, 4294967040  ;;  %p4114_p10 = scmp.eq.s32.totalorder %s3388_s16, 0 }
  0x70   : > { %3313 = dma.done.wait (%p4114_p10), [#allocation6], 8320   ;;  %p4115_p13 = pmov %p4114_p10 }
  0x71   : > { %v3341_v0 = vmov 0.0|0.0   ;;  %vm3342_vm0 = vmmov 0   ;;  %v3343_v1 = vmov 0.0   ;;  %vm243_vm1 = vcmask 125952   ;;  %v240_v2 = vld [vmem:[%s208_s10] sm:$0xff]  ;;  %v3566_v3 = vld [vmem:[%s208_s10 + $0x8] sm:$0xff] }
  0x72   : > { %3315 = vsyncadd (%p4115_p13), [#allocation6], 4294958976  ;;  %2791 = vmatprep.subr.bf16.mxu0 %v3341_v0  ;;  %2382 = vmatprep.mubr.msk.f32.mxu0 %vm3342_vm0, %v3343_v1  ;;  %v3568_v4 = vld [vmem:[%s199_s4] sm:$0xf]  ;;  %v2792_v5 = vpack.c.bf16 %v3566_v3, %v240_v2  ;;  %v328_v7 = vld [vmem:[#allocation7] sm:$0xff]  ;;  %vm247_vm2 = vcmask 130048   ;;  %v595_v40 = vlaneseq }
  0x73   : > { %v244_v6 = vsel %vm243_vm1, %v3568_v4, 0.0  ;;  %v329_v8 = vld [vmem:[#allocation7 + $0x8] sm:$0xff]  ;;  %v330_v9 = vld [vmem:[#allocation7 + $0x10] sm:$0xff]  ;;  %2417 = vmatprep.mubr.f32.mxu1 %v240_v2  ;;  %v331_v11 = vld [vmem:[#allocation7 + $0x18] sm:$0xff]  ;;  %s3344_s18 = smov 64   ;;  %vm708_vm3 = vcmask 523264  }
  0x74   : > { %245 = vadd.xlane.f32.xlu0 %v244_v6  ;;  %v3573_v10 = vpack.c.bf16 %v329_v8, %v328_v7  ;;  %2793 = vmatpush3.bf16.msra.mxu0 %v2792_v5  ;;  %v3575_v12 = vpack.c.bf16 %v331_v11, %v330_v9  ;;  %v332_v13 = vld [vmem:[#allocation7 + $0x20] sm:$0xff]  ;;  %v333_v14 = vld [vmem:[#allocation7 + $0x28] sm:$0xff]  ;;  %v334_v16 = vld [vmem:[#allocation7 + $0x30] sm:$0xff]  ;;  %v596_v41 = vshrl.u32 %v595_v40, 7  ;;  %v742_v42 = vand.u32 127, %v595_v40  ;;  %s2173_s11 = sshll.u32 %s3388_s16, 6 }
  0x75   : > { %v3582_v15 = vpack.c.bf16 %v333_v14, %v332_v13  ;;  %v335_v17 = vld [vmem:[#allocation7 + $0x38] sm:$0xff]  ;;  %v336_v19 = vld [vmem:[#allocation7 + $0x40] sm:$0xff]  ;;  %v337_v20 = vld [vmem:[#allocation7 + $0x48] sm:$0xff]  ;;  %v3345_v46 = vmov 1966171168   ;;  %vm752_vm4 = vcmask 130112   ;;  %s4053_s28 = scalar_lea.hbm %s4099_s3, %s2173_s11 }
  0x76   : > { %2795 = vmatprep.subr.bf16.mxu1 %v3573_v10  ;;  %v3586_v18 = vpack.c.bf16 %v335_v17, %v334_v16  ;;  %v3590_v21 = vpack.c.bf16 %v337_v20, %v336_v19  ;;  %v338_v22 = vld [vmem:[#allocation7 + $0x50] sm:$0xff]  ;;  %v339_v23 = vld [vmem:[#allocation7 + $0x58] sm:$0xff]  ;;  %v340_v25 = vld [vmem:[#allocation7 + $0x60] sm:$0xff]  ;;  %v3633_v43 = vsub.s32 %v742_v42, %v596_v41  ;;  %v747_v44 = vadd.s32 4294967288, %v742_v42  ;;  %s239_s30 = scalar_lea.vmem [#allocation8], %s2160_s23  ;;  %s2035_s22 = scalar_lea.sflag [#allocation4], %s3543_s25 }
  0x77   : > { %2797 = vmatpush3.bf16.msra.mxu1 %v3573_v10  ;;  %2383 = vmatmul.mubr.msk.f32.vlgmr.msra.gmra.mrb[0].mxu0 %vm247_vm2, %v3568_v4  ;;  %v3594_v24 = vpack.c.bf16 %v339_v23, %v338_v22  ;;  %v341_v26 = vld [vmem:[#allocation7 + $0x68] sm:$0xff]  ;;  %v342_v28 = vld [vmem:[#allocation7 + $0x70] sm:$0xff]  ;;  %v343_v29 = vld [vmem:[#allocation7 + $0x78] sm:$0xff]  ;;  %v593_v47 = vunpack.c.l.s4 %v3345_v46  ;;  %v3640_v52 = vsub.s32 0, %v596_v41  ;;  %vm781_vm5 = vcmask 1041409   ;;  %s2048_s5 = sshll.u32 %s239_s30, 4  ;;  %s4055_s5 = int_to_ptr.vmem [resolvable:$true] %s2048_s5 }
  0x78   : > { %2799 = vmatprep.subr.bf16.mxu1 %v3575_v12  ;;  %2452 = vmatprep.mubr.f32.mxu0 %v240_v2  ;;  %v3598_v27 = vpack.c.bf16 %v341_v26, %v340_v25  ;;  %v3602_v30 = vpack.c.bf16 %v343_v29, %v342_v28  ;;  %v2165_v31 = vld [vmem:[#allocation7 + $0x200] ss:$0 sm:$0xff]  ;;  %v3635_v45 = vsub.s32 %v747_v44, %v596_v41  ;;  %v2166_v63 = vld [vmem:[#allocation7 + $0x201] ss:$0 sm:$0xff]  ;;  %vm783_vm6 = vcmask 1042434   ;;  %s3260_s26 = scalar_lea.vmem %s4055_s5, 64 }
  0x79   : > { %v594_v48 = vunpack.c.0.s8 %v593_v47  ;;  %vm785_vm7 = vcmask 1043459   ;;  %vm520_vm8 = vcmp.gt.f32.partialorder %v3568_v4, 0.0  ;;  %vm1056_vm9 = vcmask 1043456   ;;  %p3261_p3 = scmp.ne.s32.totalorder %s4055_s5, %s3260_s26  ;;  %s3346_s16 = smov [#allocation8]  }
  0x7a   : > { %s3264_s8 = sshll.u32 %s3346_s16, 4  ;;  %s3265_s8 = int_to_ptr.vmem [resolvable:$false] %s3264_s8 }
  0x7b   : > { %2801 = vmatpush3.bf16.msra.mxu1 %v3575_v12  ;;  %v3637_v49 = vsub.s32 %v594_v48, %v596_v41  ;;  %p3262_p7 = pnand %p3261_p3, %p3453_p12  ;;  %s3266_s23 = scalar_lea.vmem %s3265_s8, 128 }
  0x7c   : > { %2803 = vmatprep.subr.bf16.mxu1 %v3582_v15  ;;  %p3267_p1 = scmp.lt.s32.totalorder %s4055_s5, %s3265_s8  ;;  %p3268_p5 = scmp.lt.s32.totalorder %s3266_s23, %s3260_s26 }
  0x7d   : > { %p3263_p9 = pneg %p3262_p7 }
  0x7e   : > { %p3269_p2 = por %p3268_p5, %p3267_p1 }
  0x7f   : > { %2805 = vmatpush3.bf16.msra.mxu1 %v3582_v15 }
  0x80   : > { %2807 = vmatprep.subr.bf16.mxu1 %v3586_v18  ;;  %p3270_p6 = pnand %p3269_p2, %p3263_p9 }
  0x83   : > { %2809 = vmatpush3.bf16.msra.mxu1 %v3586_v18 }
  0x84   : > { %2811 = vmatprep.subr.bf16.mxu1 %v3590_v21 }
  0x87   : > { %2813 = vmatpush3.bf16.msra.mxu1 %v3590_v21 }
  0x88   : > { %2815 = vmatprep.subr.bf16.mxu1 %v3594_v24 }
  0x8a   : > { %424 = vrot.lane.b32.xlu0 %v2165_v31, %s3344_s18 }
  0x8b   : > { %2817 = vmatpush3.bf16.msra.mxu1 %v3594_v24 }
  0x8c   : > { %2819 = vmatprep.subr.bf16.mxu1 %v3598_v27 }
  0x8f   : > { %2821 = vmatpush3.bf16.msra.mxu1 %v3598_v27 }
  0x90   : > { %2823 = vmatprep.subr.bf16.mxu1 %v3602_v30 }
  0x93   : > { %2825 = vmatpush3.bf16.msra.mxu1 %v3602_v30 }
  0x94   : > { %2858 = vmatprep.subr.bf16.mxu1 %v3341_v0 }
  0x96   : > { %2418 = vmatmul.mubr.f32.vlgmr.msra.gmra.mrb[0].mxu1 %v3566_v3 }
  0x97   : > { %2860 = vmatpush3.bf16.msra.mxu1 %v3573_v10  ;;  %2487 = vmatprep.mubr.msk.f32.mxu1 %vm3342_vm0, %v3343_v1 }
  0x98   : > { %2861 = vmatprep.subr.bf16.mxu1 %v3341_v0 }
  0x9b   : > { %2863 = vmatpush3.bf16.msra.mxu1 %v3575_v12 }
  0x9c   : > { %2864 = vmatprep.subr.bf16.mxu1 %v3341_v0 }
  0x9f   : > { %2866 = vmatpush3.bf16.msra.mxu1 %v3582_v15 }
  0xa0   : > { %2867 = vmatprep.subr.bf16.mxu1 %v3341_v0 }
  0xa3   : > { %2869 = vmatpush3.bf16.msra.mxu1 %v3586_v18 }
  0xa4   : > { %2870 = vmatprep.subr.bf16.mxu1 %v3341_v0 }
  0xa7   : > { %2872 = vmatpush3.bf16.msra.mxu1 %v3590_v21 }
  0xa8   : > { %2873 = vmatprep.subr.bf16.mxu1 %v3341_v0 }
  0xab   : > { %2875 = vmatpush3.bf16.msra.mxu1 %v3594_v24 }
  0xac   : > { %2876 = vmatprep.subr.bf16.mxu1 %v3341_v0 }
  0xaf   : > { %2878 = vmatpush3.bf16.msra.mxu1 %v3598_v27 }
  0xb0   : > { %2879 = vmatprep.subr.bf16.mxu1 %v3341_v0 }
  0xb3   : > { %2881 = vmatpush3.bf16.msra.mxu1 %v3602_v30 }
  0xb4   : > { %2909 = vmatprep.subr.bf16.mxu1 %v3341_v0 }
 0x101   : > { %v246_v32 = vpop.xlane.xlu0 %245 }
 0x102   : > { %v321_v33 = vmax.f32 %v246_v32, 1.0 }
 0x104   : > { %3152 = vrcp.f32 %v321_v33 }
 0x105   : > { %v425_v6 = vpop.permute.xlu0 %424 }
 0x10e   : > { %v3153_v34 = vpop.eup %3152 }
 0x14a   : > { %v317_v35 = vpop.f32.mrb[0].mxu0 }
 0x14b   : > { %v3628_v36 = vmul.f32 %v3153_v34, %v317_v35  ;;  %v2384_v37 = vpop.f32.mrb[1].mxu0 }
 0x14d   : > { %2488 = vmatmul.mubr.f32.vlgmr.msra.gmra.mrb[2].mxu1 %v3628_v36 }
 0x14e   : > { %2564 = vmatprep.mubr.msk.f32.mxu1 %vm3342_vm0, %v3343_v1 }
 0x169   : > { %v2419_v38 = vpop.f32.mrb[0].mxu1 }
 0x16a   : > { %v410_v39 = vpop.f32.mrb[1].mxu1  ;;  %v3657_v14 = vadd.f32 %v2419_v38, %v425_v6 }
 0x16b   : > { %v3653_v8 = vadd.f32 %v425_v6, %v410_v39  ;;  %v430_v6 = vld [vmem:[#allocation7 + $0x108] sm:$0xff] }
 0x220   : > { %v587_v50 = vpop.f32.mrb[2].mxu1 }
 0x221   : > { %v598_v51 = vrot.slane %v587_v50, %v3637_v49  ;;  %v2489_v53 = vpop.f32.mrb[3].mxu1 }
 0x223   : > { %v599_v54 = vcombine.high %v598_v51, %v598_v51  ;;  %v606_v55 = vrot.slane %v598_v51, %v3637_v49 }
 0x225   : > { %v613_v56 = vrot.slane %v599_v54, %v3637_v49  ;;  %v619_v57 = vrot.slane %v606_v55, %v3640_v52  ;;  %v614_v58 = vcombine.high %v606_v55, %v606_v55 }
 0x227   : > { %632 = vrot.lane.b32.xlu1 %v619_v57, %s3344_s18  ;;  %v623_v59 = vrot.slane %v613_v56, %v3640_v52  ;;  %v627_v60 = vrot.slane %v614_v58, %v3640_v52  ;;  %v615_v61 = vcombine.high %v613_v56, %v613_v56 }
 0x229   : > { %v631_v62 = vrot.slane %v615_v61, %v3640_v52 }
 0x22b   : > { %634 = vrot.lane.b32.xlu1 %v623_v59, %s3344_s18 }
 0x22f   : > { %636 = vrot.lane.b32.xlu1 %v627_v60, %s3344_s18 }
 0x233   : > { %638 = vrot.lane.b32.xlu1 %v631_v62, %s3344_s18 }
 0x237   : > { %665 = vrot.lane.b32.xlu1 %v2166_v63, %s3344_s18 }
 0x299   : > { %v633_v2 = vpop.permute.xlu1 %632 }
 0x29a   : > { %v644_v9 = vadd.f32 %v633_v2, %v3653_v8  ;;  %v645_v16 = vadd.f32 %v633_v2, %v3657_v14 }
 0x29c   : > { %v652_v17 = vmax.f32 %v644_v9, 0.0  ;;  %v653_v28 = vmax.f32 %v645_v16, 0.0  ;;  %v433_v16 = vld [vmem:[#allocation7 + $0x120] sm:$0xff] }
 0x29d   : > { %v635_v5 = vpop.permute.xlu1 %634 }
 0x29e   : > { %v646_v11 = vadd.f32 %v635_v5, %v3653_v8  ;;  %v647_v29 = vadd.f32 %v635_v5, %v3657_v14  ;;  %v429_v5 = vld [vmem:[#allocation7 + $0x100] sm:$0xff] }
 0x29f   : > { %v2826_v9 = vpack.c.bf16 %v430_v6, %v429_v5 }
 0x2a0   : > { %v654_v19 = vmax.f32 %v646_v11, 0.0  ;;  %v655_v35 = vmax.f32 %v647_v29, 0.0  ;;  %v432_v11 = vld [vmem:[#allocation7 + $0x118] sm:$0xff] }
 0x2a1   : > { %v637_v7 = vpop.permute.xlu1 %636  ;;  %2827 = vmatprep.subr.bf16.mxu0 %v2826_v9 }
 0x2a2   : > { %v648_v20 = vadd.f32 %v637_v7, %v3653_v8  ;;  %v649_v37 = vadd.f32 %v637_v7, %v3657_v14  ;;  %v431_v7 = vld [vmem:[#allocation7 + $0x110] sm:$0xff]  ;;  %2829 = vmatpush3.bf16.msra.mxu0 %v2826_v9 }
 0x2a4   : > { %v656_v31 = vmax.f32 %v648_v20, 0.0  ;;  %v657_v41 = vmax.f32 %v649_v37, 0.0  ;;  %v435_v20 = vld [vmem:[#allocation7 + $0x130] sm:$0xff] }
 0x2a5   : > { %v639_v13 = vpop.permute.xlu1 %638 }
 0x2a6   : > { %v650_v23 = vadd.f32 %v639_v13, %v3653_v8  ;;  %v651_v38 = vadd.f32 %v639_v13, %v3657_v14  ;;  %v2830_v13 = vpack.c.bf16 %v432_v11, %v431_v7 }
 0x2a8   : > { %v658_v32 = vmax.f32 %v650_v23, 0.0  ;;  %v659_v42 = vmax.f32 %v651_v38, 0.0  ;;  %2831 = vmatprep.subr.bf16.mxu0 %v2830_v13  ;;  %v436_v23 = vld [vmem:[#allocation7 + $0x138] sm:$0xff]  ;;  %v443_v38 = vld [vmem:[#allocation7 + $0x170] sm:$0xff] }
 0x2a9   : > { %v3661_v22 = vpop.permute.xlu1 %665  ;;  %2833 = vmatpush3.bf16.msra.mxu0 %v2830_v13 }
 0x2aa   : > { %v670_v25 = vmul.f32 %v3661_v22, %v654_v19  ;;  %v668_v26 = vmul.f32 %v3661_v22, %v652_v17  ;;  %v672_v33 = vmul.f32 %v3661_v22, %v656_v31  ;;  %v669_v34 = vmul.f32 %v3661_v22, %v653_v28  ;;  %v434_v17 = vld [vmem:[#allocation7 + $0x128] sm:$0xff]  ;;  %v439_v31 = vld [vmem:[#allocation7 + $0x150] sm:$0xff] }
 0x2ab   : > { %v674_v39 = vmul.f32 %v3661_v22, %v658_v32  ;;  %v671_v40 = vmul.f32 %v3661_v22, %v655_v35  ;;  %v673_v44 = vmul.f32 %v3661_v22, %v657_v41  ;;  %v675_v46 = vmul.f32 %v3661_v22, %v659_v42  ;;  %v438_v28 = vld [vmem:[#allocation7 + $0x148] sm:$0xff]  ;;  %v440_v32 = vld [vmem:[#allocation7 + $0x158] sm:$0xff] }
 0x2ac   : > { %688 = vrot.lane.b32.xlu0 %v670_v25, %s3344_s18  ;;  %684 = vrot.lane.b32.xlu1 %v668_v26, %s3344_s18  ;;  %v2834_v19 = vpack.c.bf16 %v434_v17, %v433_v16  ;;  %v2838_v25 = vpack.c.bf16 %v436_v23, %v435_v20  ;;  %v437_v26 = vld [vmem:[#allocation7 + $0x140] sm:$0xff]  ;;  %v442_v35 = vld [vmem:[#allocation7 + $0x168] sm:$0xff] }
 0x2ad   : > { %v2842_v29 = vpack.c.bf16 %v438_v28, %v437_v26  ;;  %v800_v28 = vld [vmem:[#allocation7 + $0x80] sm:$0xff] }
 0x2ae   : > { %2835 = vmatprep.subr.bf16.mxu0 %v2834_v19 }
 0x2af   : > { %2837 = vmatpush3.bf16.msra.mxu0 %v2834_v19 }
 0x2b0   : > { %692 = vrot.lane.b32.xlu0 %v672_v33, %s3344_s18  ;;  %686 = vrot.lane.b32.xlu1 %v669_v34, %s3344_s18  ;;  %v2846_v33 = vpack.c.bf16 %v440_v32, %v439_v31  ;;  %v441_v34 = vld [vmem:[#allocation7 + $0x160] sm:$0xff] }
 0x2b1   : > { %2839 = vmatprep.subr.bf16.mxu0 %v2838_v25  ;;  %v2850_v37 = vpack.c.bf16 %v442_v35, %v441_v34  ;;  %v802_v34 = vld [vmem:[#allocation7 + $0x90] sm:$0xff]  ;;  %v803_v35 = vld [vmem:[#allocation7 + $0x98] sm:$0xff] }
 0x2b3   : > { %2841 = vmatpush3.bf16.msra.mxu0 %v2838_v25 }
 0x2b4   : > { %696 = vrot.lane.b32.xlu0 %v674_v39, %s3344_s18  ;;  %690 = vrot.lane.b32.xlu1 %v671_v40, %s3344_s18  ;;  %v444_v39 = vld [vmem:[#allocation7 + $0x178] sm:$0xff] }
 0x2b5   : > { %2843 = vmatprep.subr.bf16.mxu0 %v2842_v29  ;;  %v2854_v40 = vpack.c.bf16 %v444_v39, %v443_v38  ;;  %v804_v38 = vld [vmem:[#allocation7 + $0xa0] sm:$0xff]  ;;  %v805_v39 = vld [vmem:[#allocation7 + $0xa8] sm:$0xff] }
 0x2b7   : > { %2845 = vmatpush3.bf16.msra.mxu0 %v2842_v29  ;;  %v801_v29 = vld [vmem:[#allocation7 + $0x88] sm:$0xff] }
 0x2b8   : > { %694 = vrot.lane.b32.xlu1 %v673_v44, %s3344_s18  ;;  %2847 = vmatprep.subr.bf16.mxu0 %v2846_v33  ;;  %v3719_v32 = vpack.c.bf16 %v801_v29, %v800_v28  ;;  %v978_v28 = vld [vmem:[#allocation7 + $0x1e8] sm:$0xff] }
 0x2bb   : > { %2849 = vmatpush3.bf16.msra.mxu0 %v2846_v33 }
 0x2bc   : > { %698 = vrot.lane.b32.xlu1 %v675_v46, %s3344_s18  ;;  %2851 = vmatprep.subr.bf16.mxu0 %v2850_v37 }
 0x2bf   : > { %2853 = vmatpush3.bf16.msra.mxu0 %v2850_v37  ;;  %v3723_v37 = vpack.c.bf16 %v803_v35, %v802_v34 }
 0x2c0   : > { %2855 = vmatprep.subr.bf16.mxu0 %v2854_v40 }
 0x2c3   : > { %2857 = vmatpush3.bf16.msra.mxu0 %v2854_v40  ;;  %v3729_v40 = vpack.c.bf16 %v805_v39, %v804_v38  ;;  %v3805_v39 = vld [vmem:[#allocation7 + $0x202] ss:$0 sm:$0xff] }
 0x2c4   : > { %2882 = vmatprep.subr.bf16.mxu0 %v3341_v0 }
 0x2c6   : > { %2453 = vmatmul.mubr.f32.vlgmr.msra.gmra.mrb[2].mxu0 %v3566_v3 }
 0x2c7   : > { %2494 = vmatprep.mubr.msk.f32.mxu0 %vm3342_vm0, %v3343_v1 }
 0x31e   : > { %v689_v47 = vpop.permute.xlu0 %688  ;;  %v685_v48 = vpop.permute.xlu1 %684 }
 0x31f   : > { %v709_v50 = vsel %vm708_vm3, %v685_v48, 0.0  ;;  %v715_v54 = vsel %vm708_vm3, %v689_v47, 0.0 }
 0x320   : > { %710 = vadd.xlane.f32.xlu0 %v709_v50 }
 0x322   : > { %v693_v51 = vpop.permute.xlu0 %692  ;;  %v687_v53 = vpop.permute.xlu1 %686 }
 0x323   : > { %v712_v55 = vsel %vm708_vm3, %v687_v53, 0.0  ;;  %v721_v57 = vsel %vm708_vm3, %v693_v51, 0.0 }
 0x324   : > { %716 = vadd.xlane.f32.xlu0 %v715_v54  ;;  %713 = vadd.xlane.f32.xlu1 %v712_v55 }
 0x326   : > { %v691_v56 = vpop.permute.xlu1 %690  ;;  %v697_v59 = vpop.permute.xlu0 %696 }
 0x327   : > { %v718_v58 = vsel %vm708_vm3, %v691_v56, 0.0  ;;  %v727_v61 = vsel %vm708_vm3, %v697_v59, 0.0 }
 0x328   : > { %722 = vadd.xlane.f32.xlu1 %v721_v57  ;;  %719 = vadd.xlane.f32.xlu0 %v718_v58 }
 0x32a   : > { %v695_v60 = vpop.permute.xlu1 %694 }
 0x32b   : > { %v724_v62 = vsel %vm708_vm3, %v695_v60, 0.0 }
 0x32c   : > { %728 = vadd.xlane.f32.xlu1 %v727_v61  ;;  %725 = vadd.xlane.f32.xlu0 %v724_v62 }
 0x32e   : > { %v699_v63 = vpop.permute.xlu1 %698 }
 0x32f   : > { %v730_v2 = vsel %vm708_vm3, %v699_v63, 0.0 }
 0x330   : > { %731 = vadd.xlane.f32.xlu0 %v730_v2 }
 0x399   : > { %v2454_v20 = vpop.f32.mrb[2].mxu0 }
 0x39a   : > { %v511_v23 = vpop.f32.mrb[3].mxu0 }
 0x39b   : > { %v3715_v25 = vpack.c.bf16 %v2454_v20, %v511_v23  ;;  %v976_v20 = vld [vmem:[#allocation7 + $0x1d8] sm:$0xff] }
 0x39d   : > { %2884 = vmatpush3.bf16.msra.mxu0 %v3715_v25 }
 0x39e   : > { %2885 = vmatprep.subr.bf16.mxu0 %v3341_v0 }
 0x3ad   : > { %v711_v41 = vpop.xlane.xlu0 %710 }
 0x3ae   : > { %v746_v56 = vrot.slane %v711_v41, %v3633_v43  ;;  %v806_v41 = vld [vmem:[#allocation7 + $0xb0] sm:$0xff] }
 0x3b1   : > { %v717_v42 = vpop.xlane.xlu0 %716  ;;  %v714_v44 = vpop.xlane.xlu1 %713 }
 0x3b2   : > { %v757_v51 = vrot.slane %v717_v42, %v3633_v43  ;;  %v751_v53 = vrot.slane %v714_v44, %v3635_v45  ;;  %v807_v42 = vld [vmem:[#allocation7 + $0xb8] sm:$0xff] }
 0x3b3   : > { %v3733_v44 = vpack.c.bf16 %v807_v42, %v806_v41 }
 0x3b4   : > { %v753_v60 = vsel %vm752_vm4, %v751_v53, %v746_v56  ;;  %v814_v56 = vld [vmem:[#allocation7 + $0xf0] sm:$0xff] }
 0x3b5   : > { %v720_v46 = vpop.xlane.xlu0 %719  ;;  %v723_v47 = vpop.xlane.xlu1 %722 }
 0x3b6   : > { %v761_v48 = vrot.slane %v720_v46, %v3635_v45  ;;  %v766_v3 = vrot.slane %v723_v47, %v3633_v43  ;;  %v808_v46 = vld [vmem:[#allocation7 + $0xc0] sm:$0xff]  ;;  %v809_v47 = vld [vmem:[#allocation7 + $0xc8] sm:$0xff] }
 0x3b8   : > { %v762_v57 = vsel %vm752_vm4, %v761_v48, %v757_v51  ;;  %v3737_v48 = vpack.c.bf16 %v809_v47, %v808_v46  ;;  %v811_v51 = vld [vmem:[#allocation7 + $0xd8] sm:$0xff] }
 0x3b9   : > { %v726_v50 = vpop.xlane.xlu0 %725  ;;  %v729_v55 = vpop.xlane.xlu1 %728  ;;  %v782_v63 = vsel %vm781_vm5, %v762_v57, %v753_v60  ;;  %v815_v57 = vld [vmem:[#allocation7 + $0xf8] sm:$0xff]  ;;  %v967_v60 = vld [vmem:[#allocation7 + $0x190] sm:$0xff] }
 0x3ba   : > { %v770_v54 = vrot.slane %v726_v50, %v3635_v45  ;;  %v775_v61 = vrot.slane %v729_v55, %v3633_v43  ;;  %v810_v50 = vld [vmem:[#allocation7 + $0xd0] sm:$0xff] }
 0x3bb   : > { %v3741_v53 = vpack.c.bf16 %v811_v51, %v810_v50  ;;  %v3826_v51 = vld [vmem:[#allocation7 + $0x203] ss:$0 sm:$0xff] }
 0x3bc   : > { %v771_v58 = vsel %vm752_vm4, %v770_v54, %v766_v3  ;;  %v812_v54 = vld [vmem:[#allocation7 + $0xe0] sm:$0xff]  ;;  %v813_v3 = vld [vmem:[#allocation7 + $0xe8] sm:$0xff] }
 0x3bd   : > { %v732_v59 = vpop.xlane.xlu0 %731  ;;  %v784_v5 = vsel %vm783_vm6, %v771_v58, %v782_v63  ;;  %v3745_v55 = vpack.c.bf16 %v813_v3, %v812_v54  ;;  %v3749_v58 = vpack.c.bf16 %v815_v57, %v814_v56 }
 0x3be   : > { %v779_v62 = vrot.slane %v732_v59, %v3635_v45  ;;  %v966_v59 = vld [vmem:[#allocation7 + $0x188] sm:$0xff] }
 0x3c0   : > { %v780_v2 = vsel %vm752_vm4, %v779_v62, %v775_v61  ;;  %v968_v62 = vld [vmem:[#allocation7 + $0x198] sm:$0xff] }
 0x3c1   : > { %v786_v6 = vsel %vm785_vm7, %v780_v2, %v784_v5  ;;  %v3776_v63 = vpack.c.bf16 %v968_v62, %v967_v60  ;;  %v969_v2 = vld [vmem:[#allocation7 + $0x1a0] sm:$0xff]  ;;  %v970_v5 = vld [vmem:[#allocation7 + $0x1a8] sm:$0xff] }
 0x3c2   : > { %v788_v7 = vsel %vm520_vm8, %v786_v6, -1e+30  ;;  %v3780_v6 = vpack.c.bf16 %v970_v5, %v969_v2 }
 0x3c3   : > { %v789_v9 = vsel %vm243_vm1, %v788_v7, -inf }
 0x3c4   : > { %790 = vmax.xlane.f32.xlu1 %v789_v9  ;;  %v972_v9 = vld [vmem:[#allocation7 + $0x1b8] sm:$0xff] }
 0x451   : > { %v791_v11 = vpop.xlane.xlu1 %790 }
 0x452   : > { %v792_v13 = vsub.f32 %v788_v7, %v791_v11  ;;  %v971_v7 = vld [vmem:[#allocation7 + $0x1b0] sm:$0xff] }
 0x453   : > { %v3784_v11 = vpack.c.bf16 %v972_v9, %v971_v7 }
 0x454   : > { %v793_v16 = vmul.f32 1.442695, %v792_v13  ;;  %v973_v13 = vld [vmem:[#allocation7 + $0x1c0] sm:$0xff] }
 0x456   : > { %3154 = vpow2.f32 %v793_v16  ;;  %v974_v16 = vld [vmem:[#allocation7 + $0x1c8] sm:$0xff] }
 0x460   : > { %v3155_v17 = vpop.eup %3154 }
 0x461   : > { %v795_v19 = vsel %vm243_vm1, %v3155_v17, 0.0 }
 0x462   : > { %796 = vadd.xlane.f32.xlu0 %v795_v19  ;;  %v975_v19 = vld [vmem:[#allocation7 + $0x1d0] sm:$0xff] }
 0x463   : > { %v3792_v23 = vpack.c.bf16 %v976_v20, %v975_v19 }
 0x4ef   : > { %v797_v26 = vpop.xlane.xlu0 %796 }
 0x4f0   : > { %3156 = vrcp.f32 %v797_v26  ;;  %v977_v26 = vld [vmem:[#allocation7 + $0x1e0] sm:$0xff] }
 0x4f1   : > { %v3797_v29 = vpack.c.bf16 %v978_v28, %v977_v26 }
 0x4fa   : > { %v3157_v31 = vpop.eup %3156 }
 0x4fb   : > { %v799_v33 = vmul.f32 %v3157_v31, %v3155_v17  ;;  %v3788_v17 = vpack.c.bf16 %v974_v16, %v973_v13  ;;  %v979_v31 = vld [vmem:[#allocation7 + $0x1f0] sm:$0xff] }
 0x4fd   : > { %2495 = vmatmul.mubr.msk.f32.vlgmr.msra.gmra.mrb[4].mxu0 %vm247_vm2, %v799_v33  ;;  %v980_v33 = vld [vmem:[#allocation7 + $0x1f8] sm:$0xff] }
 0x4fe   : > { %2887 = vmatpush3.bf16.msra.mxu0 %v3719_v32  ;;  %2529 = vmatprep.mubr.msk.f32.mxu0 %vm3342_vm0, %v3343_v1  ;;  %v3801_v34 = vpack.c.bf16 %v980_v33, %v979_v31 }
 0x4ff   : > { %2888 = vmatprep.subr.bf16.mxu0 %v3341_v0 }
 0x502   : > { %2890 = vmatpush3.bf16.msra.mxu0 %v3723_v37 }
 0x503   : > { %2891 = vmatprep.subr.bf16.mxu0 %v3341_v0 }
 0x506   : > { %2893 = vmatpush3.bf16.msra.mxu0 %v3729_v40 }
 0x507   : > { %2894 = vmatprep.subr.bf16.mxu0 %v3341_v0 }
 0x50a   : > { %2896 = vmatpush3.bf16.msra.mxu0 %v3733_v44 }
 0x50b   : > { %2897 = vmatprep.subr.bf16.mxu0 %v3341_v0 }
 0x50e   : > { %2899 = vmatpush3.bf16.msra.mxu0 %v3737_v48 }
 0x50f   : > { %2900 = vmatprep.subr.bf16.mxu0 %v3341_v0 }
 0x512   : > { %2902 = vmatpush3.bf16.msra.mxu0 %v3741_v53 }
 0x513   : > { %2903 = vmatprep.subr.bf16.mxu0 %v3341_v0 }
 0x516   : > { %2905 = vmatpush3.bf16.msra.mxu0 %v3745_v55 }
 0x517   : > { %2906 = vmatprep.subr.bf16.mxu0 %v3341_v0 }
 0x51a   : > { %2908 = vmatpush3.bf16.msra.mxu0 %v3749_v58 }
 0x51b   : > { %2933 = vmatprep.subr.bf16.mxu0 %v3341_v0 }
 0x51d   : > { %2530 = vmatmul.mubr.f32.vlgmr.msra.gmra.mrb[6].mxu0 %v3628_v36  ;;  %v965_v36 = vld [vmem:[#allocation7 + $0x180] sm:$0xff] }
 0x51e   : > { %2935 = vmatpush3.bf16.msra.mxu0 %v3573_v10  ;;  %2599 = vmatprep.mubr.msk.f32.mxu0 %vm3342_vm0, %v3343_v1  ;;  %v3773_v61 = vpack.c.bf16 %v966_v59, %v965_v36 }
 0x51f   : > { %2936 = vmatprep.subr.bf16.mxu0 %v3341_v0 }
 0x520   : > { %2911 = vmatpush3.bf16.msra.mxu1 %v3773_v61 }
 0x521   : > { %2912 = vmatprep.subr.bf16.mxu1 %v3341_v0 }
 0x522   : > { %2938 = vmatpush3.bf16.msra.mxu0 %v3575_v12 }
 0x523   : > { %2939 = vmatprep.subr.bf16.mxu0 %v3341_v0 }
 0x524   : > { %2914 = vmatpush3.bf16.msra.mxu1 %v3776_v63 }
 0x525   : > { %2915 = vmatprep.subr.bf16.mxu1 %v3341_v0 }
 0x526   : > { %2941 = vmatpush3.bf16.msra.mxu0 %v3582_v15 }
 0x527   : > { %2942 = vmatprep.subr.bf16.mxu0 %v3341_v0 }
 0x528   : > { %2917 = vmatpush3.bf16.msra.mxu1 %v3780_v6 }
 0x529   : > { %2918 = vmatprep.subr.bf16.mxu1 %v3341_v0 }
 0x52a   : > { %2944 = vmatpush3.bf16.msra.mxu0 %v3586_v18 }
 0x52b   : > { %2945 = vmatprep.subr.bf16.mxu0 %v3341_v0 }
 0x52c   : > { %2920 = vmatpush3.bf16.msra.mxu1 %v3784_v11 }
 0x52d   : > { %2921 = vmatprep.subr.bf16.mxu1 %v3341_v0 }
 0x52e   : > { %2947 = vmatpush3.bf16.msra.mxu0 %v3590_v21 }
 0x52f   : > { %2948 = vmatprep.subr.bf16.mxu0 %v3341_v0 }
 0x530   : > { %2923 = vmatpush3.bf16.msra.mxu1 %v3788_v17 }
 0x531   : > { %2924 = vmatprep.subr.bf16.mxu1 %v3341_v0 }
 0x532   : > { %2950 = vmatpush3.bf16.msra.mxu0 %v3594_v24 }
 0x533   : > { %2951 = vmatprep.subr.bf16.mxu0 %v3341_v0 }
 0x534   : > { %2926 = vmatpush3.bf16.msra.mxu1 %v3792_v23 }
 0x535   : > { %2927 = vmatprep.subr.bf16.mxu1 %v3341_v0 }
 0x536   : > { %2953 = vmatpush3.bf16.msra.mxu0 %v3598_v27 }
 0x537   : > { %2954 = vmatprep.subr.bf16.mxu0 %v3341_v0 }
 0x538   : > { %2929 = vmatpush3.bf16.msra.mxu1 %v3797_v29 }
 0x539   : > { %2930 = vmatprep.subr.bf16.mxu1 %v3341_v0 }
 0x53a   : > { %2956 = vmatpush3.bf16.msra.mxu0 %v3602_v30 }
 0x53b   : > { %2957 = vmatprep.subr.bf16.mxu0 %v3341_v0 }
 0x53c   : > { %2932 = vmatpush3.bf16.msra.mxu1 %v3801_v34 }
 0x53d   : > { %2960 = vmatprep.subr.bf16.mxu1 %v3341_v0 }
 0x5d0   : > { %v885_v35 = vpop.f32.mrb[4].mxu0 }
 0x5d1   : > { %v2496_v38 = vpop.f32.mrb[5].mxu0 }
 0x5f0   : > { %v955_v41 = vpop.f32.mrb[6].mxu0 }
 0x5f1   : > { %v956_v42 = vadd.f32 %v955_v41, %v885_v35  ;;  %v2531_v46 = vpop.f32.mrb[7].mxu0 }
 0x5f3   : > { %v963_v47 = vadd.f32 %v3805_v39, %v956_v42 }
 0x5f5   : > { %v964_v50 = vmax.f32 %v963_v47, 0.0 }
 0x5f7   : > { %2565 = vmatmul.mubr.f32.vlgmr.msra.gmra.mrb[4].mxu1 %v964_v50 }
 0x5f8   : > { %2962 = vmatpush3.bf16.msra.mxu1 %v3719_v32  ;;  %2641 = vmatprep.mubr.msk.f32.mxu1 %vm3342_vm0, %v3343_v1 }
 0x5f9   : > { %2963 = vmatprep.subr.bf16.mxu1 %v3341_v0 }
 0x5fc   : > { %2965 = vmatpush3.bf16.msra.mxu1 %v3723_v37 }
 0x5fd   : > { %2966 = vmatprep.subr.bf16.mxu1 %v3341_v0 }
 0x600   : > { %2968 = vmatpush3.bf16.msra.mxu1 %v3729_v40 }
 0x601   : > { %2969 = vmatprep.subr.bf16.mxu1 %v3341_v0 }
 0x604   : > { %2971 = vmatpush3.bf16.msra.mxu1 %v3733_v44 }
 0x605   : > { %2972 = vmatprep.subr.bf16.mxu1 %v3341_v0 }
 0x608   : > { %2974 = vmatpush3.bf16.msra.mxu1 %v3737_v48 }
 0x609   : > { %2975 = vmatprep.subr.bf16.mxu1 %v3341_v0 }
 0x60c   : > { %2977 = vmatpush3.bf16.msra.mxu1 %v3741_v53 }
 0x60d   : > { %2978 = vmatprep.subr.bf16.mxu1 %v3341_v0 }
 0x610   : > { %2980 = vmatpush3.bf16.msra.mxu1 %v3745_v55 }
 0x611   : > { %2981 = vmatprep.subr.bf16.mxu1 %v3341_v0 }
 0x614   : > { %2983 = vmatpush3.bf16.msra.mxu1 %v3749_v58 }
 0x615   : > { %3008 = vmatprep.subr.bf16.mxu1 %v3341_v0 }
 0x6ca   : > { %v1051_v54 = vpop.f32.mrb[4].mxu1 }
 0x6cb   : > { %v1052_v3 = vadd.f32 %v3826_v51, %v1051_v54  ;;  %v2566_v56 = vpop.f32.mrb[5].mxu1 }
 0x6cd   : > { %v1055_v57 = vmul.f32 %v1052_v3, %v1052_v3 }
 0x6cf   : > { %v1057_v36 = vsel %vm1056_vm9, %v1055_v57, 0.0 }
 0x6d0   : > { %1058 = vadd.xlane.f32.xlu1 %v1057_v36 }
 0x75d   : > { %v1059_v59 = vpop.xlane.xlu1 %1058 }
 0x75e   : > { %v1060_v60 = vmax.f32 %v1059_v59, 1e-24 }
 0x760   : > { %3158 = vrsqrt.f32 %v1060_v60 }
 0x76a   : > { %v3159_v62 = vpop.eup %3158 }
 0x76b   : > { %v1062_v2 = vmul.f32 %v3159_v62, %v1052_v3 }
 0x76d   : > { %2600 = vmatmul.mubr.f32.vlgmr.msra.gmra.mrb[8].mxu0 %v1062_v2  ;;  %2642 = vmatmul.mubr.f32.vlgmr.msra.gmra.mrb[6].mxu1 %v1062_v2 }
 0x76e   : > { %2959 = vmatpush3.bf16.msra.mxu0 %v3715_v25  ;;  %2606 = vmatprep.mubr.msk.f32.mxu0 %vm3342_vm0, %v3343_v1 }
 0x76f   : > { %2984 = vmatprep.subr.bf16.mxu0 %v3341_v0  ;;  %3010 = vmatpush3.bf16.msra.mxu1 %v3573_v10 }
 0x770   : > { %3011 = vmatprep.subr.bf16.mxu1 %v3341_v0  ;;  %2711 = vmatprep.mubr.msk.f32.mxu1 %vm3342_vm0, %v3343_v1 }
 0x773   : > { %3013 = vmatpush3.bf16.msra.mxu1 %v3575_v12 }
 0x774   : > { %3014 = vmatprep.subr.bf16.mxu1 %v3341_v0 }
 0x777   : > { %3016 = vmatpush3.bf16.msra.mxu1 %v3582_v15 }
 0x778   : > { %3017 = vmatprep.subr.bf16.mxu1 %v3341_v0 }
 0x77b   : > { %3019 = vmatpush3.bf16.msra.mxu1 %v3586_v18 }
 0x77c   : > { %3020 = vmatprep.subr.bf16.mxu1 %v3341_v0 }
 0x77f   : > { %3022 = vmatpush3.bf16.msra.mxu1 %v3590_v21 }
 0x780   : > { %3023 = vmatprep.subr.bf16.mxu1 %v3341_v0 }
 0x783   : > { %3025 = vmatpush3.bf16.msra.mxu1 %v3594_v24 }
 0x784   : > { %3026 = vmatprep.subr.bf16.mxu1 %v3341_v0 }
 0x787   : > { %3028 = vmatpush3.bf16.msra.mxu1 %v3598_v27 }
 0x788   : > { %3029 = vmatprep.subr.bf16.mxu1 %v3341_v0 }
 0x78b   : > { %3031 = vmatpush3.bf16.msra.mxu1 %v3602_v30 }
 0x78c   : > { %3059 = vmatprep.subr.bf16.mxu1 %v3341_v0 }
 0x840   : > { %v1129_v10 = vpop.f32.mrb[8].mxu0  ;;  %v3852_v12 = vpop.f32.mrb[6].mxu1 }
 0x841   : > { %v1140_v15 = vrot.slane %v1129_v10, %v3637_v49  ;;  %v2601_v18 = vpop.f32.mrb[9].mxu0  ;;  %v2643_v21 = vpop.f32.mrb[7].mxu1 }
 0x843   : > { %v1141_v5 = vcombine.high %v1140_v15, %v1140_v15  ;;  %v1148_v24 = vrot.slane %v1140_v15, %v3637_v49 }
 0x845   : > { %v1155_v7 = vrot.slane %v1141_v5, %v3637_v49  ;;  %v1161_v27 = vrot.slane %v1148_v24, %v3640_v52  ;;  %v1156_v9 = vcombine.high %v1148_v24, %v1148_v24 }
 0x847   : > { %1174 = vrot.lane.b32.xlu0 %v1161_v27, %s3344_s18  ;;  %v1165_v30 = vrot.slane %v1155_v7, %v3640_v52  ;;  %v1157_v13 = vcombine.high %v1155_v7, %v1155_v7  ;;  %v1169_v19 = vrot.slane %v1156_v9, %v3640_v52 }
 0x849   : > { %1176 = vrot.lane.b32.xlu1 %v1165_v30, %s3344_s18  ;;  %v1173_v16 = vrot.slane %v1157_v13, %v3640_v52 }
 0x84b   : > { %1180 = vrot.lane.b32.xlu0 %v1173_v16, %s3344_s18 }
 0x84d   : > { %1178 = vrot.lane.b32.xlu1 %v1169_v19, %s3344_s18 }
 0x8b9   : > { %v1175_v20 = vpop.permute.xlu0 %1174 }
 0x8ba   : > { %v1186_v26 = vadd.f32 %v1175_v20, %v3653_v8  ;;  %v1187_v28 = vadd.f32 %v1175_v20, %v3657_v14 }
 0x8bb   : > { %v1177_v31 = vpop.permute.xlu1 %1176 }
 0x8bc   : > { %v1194_v33 = vmax.f32 %v1186_v26, 0.0  ;;  %v1195_v35 = vmax.f32 %v1187_v28, 0.0  ;;  %v1188_v38 = vadd.f32 %v1177_v31, %v3653_v8  ;;  %v1189_v41 = vadd.f32 %v1177_v31, %v3657_v14 }
 0x8bd   : > { %v1181_v47 = vpop.permute.xlu0 %1180 }
 0x8be   : > { %v1196_v42 = vmax.f32 %v1188_v38, 0.0  ;;  %v1197_v46 = vmax.f32 %v1189_v41, 0.0  ;;  %v1202_v54 = vmul.f32 %v1194_v33, %v3661_v22  ;;  %v1203_v3 = vmul.f32 %v1195_v35, %v3661_v22 }
 0x8bf   : > { %v1179_v50 = vpop.permute.xlu1 %1178  ;;  %v1192_v36 = vadd.f32 %v1181_v47, %v3653_v8  ;;  %v1193_v59 = vadd.f32 %v1181_v47, %v3657_v14 }
 0x8c0   : > { %v1190_v56 = vadd.f32 %v1179_v50, %v3653_v8  ;;  %v1191_v57 = vadd.f32 %v1179_v50, %v3657_v14  ;;  %1218 = vrot.lane.b32.xlu1 %v1202_v54, %s3344_s18  ;;  %1220 = vrot.lane.b32.xlu0 %v1203_v3, %s3344_s18  ;;  %v1204_v2 = vmul.f32 %v1196_v42, %v3661_v22 }
 0x8c1   : > { %v1205_v10 = vmul.f32 %v1197_v46, %v3661_v22  ;;  %v1200_v15 = vmax.f32 %v1192_v36, 0.0  ;;  %v1201_v18 = vmax.f32 %v1193_v59, 0.0 }
 0x8c2   : > { %v1198_v60 = vmax.f32 %v1190_v56, 0.0  ;;  %v1199_v62 = vmax.f32 %v1191_v57, 0.0 }
 0x8c3   : > { %v1209_v24 = vmul.f32 %v1201_v18, %v3661_v22  ;;  %v1208_v7 = vmul.f32 %v1200_v15, %v3661_v22 }
 0x8c4   : > { %1222 = vrot.lane.b32.xlu1 %v1204_v2, %s3344_s18  ;;  %1224 = vrot.lane.b32.xlu0 %v1205_v10, %s3344_s18  ;;  %v1206_v21 = vmul.f32 %v1198_v60, %v3661_v22  ;;  %v1207_v5 = vmul.f32 %v1199_v62, %v3661_v22 }
 0x8c8   : > { %1226 = vrot.lane.b32.xlu1 %v1206_v21, %s3344_s18  ;;  %1228 = vrot.lane.b32.xlu0 %v1207_v5, %s3344_s18 }
 0x8cc   : > { %1232 = vrot.lane.b32.xlu0 %v1209_v24, %s3344_s18  ;;  %1230 = vrot.lane.b32.xlu1 %v1208_v7, %s3344_s18 }
 0x932   : > { %v1219_v27 = vpop.permute.xlu1 %1218  ;;  %v1221_v9 = vpop.permute.xlu0 %1220 }
 0x933   : > { %v1242_v30 = vsel %vm708_vm3, %v1219_v27, 0.0  ;;  %v1245_v13 = vsel %vm708_vm3, %v1221_v9, 0.0 }
 0x934   : > { %1243 = vadd.xlane.f32.xlu1 %v1242_v30  ;;  %1246 = vadd.xlane.f32.xlu0 %v1245_v13 }
 0x936   : > { %v1223_v16 = vpop.permute.xlu1 %1222  ;;  %v1225_v19 = vpop.permute.xlu0 %1224 }
 0x937   : > { %v1248_v20 = vsel %vm708_vm3, %v1223_v16, 0.0  ;;  %v1251_v26 = vsel %vm708_vm3, %v1225_v19, 0.0 }
 0x938   : > { %1249 = vadd.xlane.f32.xlu0 %v1248_v20  ;;  %1252 = vadd.xlane.f32.xlu1 %v1251_v26 }
 0x93a   : > { %v1227_v28 = vpop.permute.xlu1 %1226  ;;  %v1229_v31 = vpop.permute.xlu0 %1228 }
 0x93b   : > { %v1254_v33 = vsel %vm708_vm3, %v1227_v28, 0.0  ;;  %v1257_v35 = vsel %vm708_vm3, %v1229_v31, 0.0 }
 0x93c   : > { %1255 = vadd.xlane.f32.xlu0 %v1254_v33  ;;  %1258 = vadd.xlane.f32.xlu1 %v1257_v35 }
 0x93e   : > { %v1231_v38 = vpop.permute.xlu1 %1230  ;;  %v1233_v41 = vpop.permute.xlu0 %1232 }
 0x93f   : > { %v1260_v42 = vsel %vm708_vm3, %v1231_v38, 0.0  ;;  %v1263_v46 = vsel %vm708_vm3, %v1233_v41, 0.0 }
 0x940   : > { %1261 = vadd.xlane.f32.xlu0 %v1260_v42  ;;  %1264 = vadd.xlane.f32.xlu1 %v1263_v46 }
 0x9c1   : > { %v1244_v47 = vpop.xlane.xlu1 %1243  ;;  %v1247_v50 = vpop.xlane.xlu0 %1246 }
 0x9c2   : > { %v1277_v60 = vrot.slane %v1244_v47, %v3633_v43  ;;  %v1281_v62 = vrot.slane %v1247_v50, %v3635_v45 }
 0x9c4   : > { %v1282_v24 = vsel %vm752_vm4, %v1281_v62, %v1277_v60 }
 0x9c5   : > { %v1253_v54 = vpop.xlane.xlu1 %1252  ;;  %v1250_v3 = vpop.xlane.xlu0 %1249 }
 0x9c6   : > { %v1290_v56 = vrot.slane %v1253_v54, %v3635_v45  ;;  %v1286_v57 = vrot.slane %v1250_v3, %v3633_v43 }
 0x9c8   : > { %v1291_v15 = vsel %vm752_vm4, %v1290_v56, %v1286_v57 }
 0x9c9   : > { %v1259_v36 = vpop.xlane.xlu1 %1258  ;;  %v1256_v59 = vpop.xlane.xlu0 %1255  ;;  %v1310_v9 = vsel %vm781_vm5, %v1291_v15, %v1282_v24 }
 0x9ca   : > { %v1299_v2 = vrot.slane %v1259_v36, %v3635_v45  ;;  %v1295_v10 = vrot.slane %v1256_v59, %v3633_v43 }
 0x9cc   : > { %v1300_v18 = vsel %vm752_vm4, %v1299_v2, %v1295_v10 }
 0x9cd   : > { %v1265_v21 = vpop.xlane.xlu1 %1264  ;;  %v1262_v5 = vpop.xlane.xlu0 %1261  ;;  %v1311_v13 = vsel %vm783_vm6, %v1300_v18, %v1310_v9 }
 0x9ce   : > { %v1308_v7 = vrot.slane %v1265_v21, %v3635_v45  ;;  %v1304_v27 = vrot.slane %v1262_v5, %v3633_v43 }
 0x9d0   : > { %v1309_v30 = vsel %vm752_vm4, %v1308_v7, %v1304_v27 }
 0x9d1   : > { %v1312_v16 = vsel %vm785_vm7, %v1309_v30, %v1311_v13 }
 0x9d2   : > { %v1314_v19 = vsel %vm520_vm8, %v1312_v16, -1e+30 }
 0x9d3   : > { %v1315_v20 = vsel %vm243_vm1, %v1314_v19, -inf }
 0x9d4   : > { %1316 = vmax.xlane.f32.xlu0 %v1315_v20 }
 0xa61   : > { %v1317_v26 = vpop.xlane.xlu0 %1316 }
 0xa62   : > { %v1318_v28 = vsub.f32 %v1314_v19, %v1317_v26 }
 0xa64   : > { %v1319_v31 = vmul.f32 1.442695, %v1318_v28 }
 0xa66   : > { %3160 = vpow2.f32 %v1319_v31 }
 0xa70   : > { %v3161_v33 = vpop.eup %3160 }
 0xa71   : > { %v1321_v35 = vsel %vm243_vm1, %v3161_v33, 0.0 }
 0xa72   : > { %1322 = vadd.xlane.f32.xlu1 %v1321_v35 }
 0xaff   : > { %v1323_v38 = vpop.xlane.xlu1 %1322 }
 0xb00   : > { %3162 = vrcp.f32 %v1323_v38 }
 0xb0a   : > { %v3163_v41 = vpop.eup %3162 }
 0xb0b   : > { %v1325_v42 = vmul.f32 %v3163_v41, %v3161_v33 }
 0xb0d   : > { %2607 = vmatmul.mubr.msk.f32.vlgmr.msra.gmra.mrb[10].mxu0 %vm247_vm2, %v1325_v42 }
 0xb0e   : > { %2986 = vmatpush3.bf16.msra.mxu0 %v3773_v61  ;;  %2676 = vmatprep.mubr.msk.f32.mxu0 %vm3342_vm0, %v3343_v1 }
 0xb0f   : > { %2987 = vmatprep.subr.bf16.mxu0 %v3341_v0 }
 0xb12   : > { %2989 = vmatpush3.bf16.msra.mxu0 %v3776_v63 }
 0xb13   : > { %2990 = vmatprep.subr.bf16.mxu0 %v3341_v0 }
 0xb16   : > { %2992 = vmatpush3.bf16.msra.mxu0 %v3780_v6 }
 0xb17   : > { %2993 = vmatprep.subr.bf16.mxu0 %v3341_v0 }
 0xb1a   : > { %2995 = vmatpush3.bf16.msra.mxu0 %v3784_v11 }
 0xb1b   : > { %2996 = vmatprep.subr.bf16.mxu0 %v3341_v0 }
 0xb1e   : > { %2998 = vmatpush3.bf16.msra.mxu0 %v3788_v17 }
 0xb1f   : > { %2999 = vmatprep.subr.bf16.mxu0 %v3341_v0 }
 0xb22   : > { %3001 = vmatpush3.bf16.msra.mxu0 %v3792_v23 }
 0xb23   : > { %3002 = vmatprep.subr.bf16.mxu0 %v3341_v0 }
 0xb26   : > { %3004 = vmatpush3.bf16.msra.mxu0 %v3797_v29 }
 0xb27   : > { %3005 = vmatprep.subr.bf16.mxu0 %v3341_v0 }
 0xb2a   : > { %3007 = vmatpush3.bf16.msra.mxu0 %v3801_v34 }
 0xb2b   : > { %3032 = vmatprep.subr.bf16.mxu0 %v3341_v0 }
 0xbe0   : > { %v1395_v46 = vpop.f32.mrb[10].mxu0 }
 0xbe1   : > { %v1466_v47 = vadd.f32 %v3852_v12, %v1395_v46  ;;  %v2608_v50 = vpop.f32.mrb[11].mxu0 }
 0xbe3   : > { %v1469_v54 = vadd.f32 %v3805_v39, %v1466_v47 }
 0xbe5   : > { %v1470_v3 = vmax.f32 %v1469_v54, 0.0 }
 0xbe7   : > { %2677 = vmatmul.mubr.f32.vlgmr.msra.gmra.mrb[12].mxu0 %v1470_v3 }
 0xbe8   : > { %3034 = vmatpush3.bf16.msra.mxu0 %v3715_v25  ;;  %2718 = vmatprep.mubr.msk.f32.mxu0 %vm3342_vm0, %v3343_v1 }
 0xbe9   : > { %3035 = vmatprep.subr.bf16.mxu0 %v3341_v0 }
 0xcba   : > { %v1537_v56 = vpop.f32.mrb[12].mxu0 }
 0xcbb   : > { %v1538_v57 = vadd.f32 %v3826_v51, %v1537_v56  ;;  %v2678_v36 = vpop.f32.mrb[13].mxu0 }
 0xcbd   : > { %v1541_v59 = vmul.f32 %v1538_v57, %v1538_v57 }
 0xcbf   : > { %v1542_v60 = vsel %vm1056_vm9, %v1541_v59, 0.0 }
 0xcc0   : > { %1543 = vadd.xlane.f32.xlu0 %v1542_v60 }
 0xd4d   : > { %v1544_v12 = vpop.xlane.xlu0 %1543 }
 0xd4e   : > { %v1545_v62 = vmax.f32 %v1544_v12, 1e-24 }
 0xd50   : > { %3164 = vrsqrt.f32 %v1545_v62 }
 0xd5a   : > { %v3165_v2 = vpop.eup %3164 }
 0xd5b   : > { %v3943_v10 = vmul.f32 %v3165_v2, %v1538_v57 }
 0xd5d   : > { %2712 = vmatmul.mubr.f32.vlgmr.msra.gmra.mrb[8].mxu1 %v3943_v10 }
 0xd5e   : > { %3061 = vmatpush3.bf16.msra.mxu1 %v3773_v61  ;;  %2788 = vmatprep.mubr.msk.f32.mxu1 %vm3342_vm0, %v3343_v1 }
 0xd5f   : > { %3062 = vmatprep.subr.bf16.mxu1 %v3341_v0 }
 0xd62   : > { %3064 = vmatpush3.bf16.msra.mxu1 %v3776_v63 }
 0xd63   : > { %3065 = vmatprep.subr.bf16.mxu1 %v3341_v0 }
 0xd66   : > { %3067 = vmatpush3.bf16.msra.mxu1 %v3780_v6 }
 0xd67   : > { %3068 = vmatprep.subr.bf16.mxu1 %v3341_v0 }
 0xd6a   : > { %3070 = vmatpush3.bf16.msra.mxu1 %v3784_v11 }
 0xd6b   : > { %3071 = vmatprep.subr.bf16.mxu1 %v3341_v0 }
 0xd6e   : > { %3073 = vmatpush3.bf16.msra.mxu1 %v3788_v17 }
 0xd6f   : > { %3074 = vmatprep.subr.bf16.mxu1 %v3341_v0 }
 0xd72   : > { %3076 = vmatpush3.bf16.msra.mxu1 %v3792_v23 }
 0xd73   : > { %3077 = vmatprep.subr.bf16.mxu1 %v3341_v0 }
 0xd76   : > { %3079 = vmatpush3.bf16.msra.mxu1 %v3797_v29 }
 0xd77   : > { %3080 = vmatprep.subr.bf16.mxu1 %v3341_v0 }
 0xd7a   : > { %3082 = vmatpush3.bf16.msra.mxu1 %v3801_v34 }
 0xe30   : > { %v1614_v25 = vpop.f32.mrb[8].mxu1 }
 0xe31   : > { %v1625_v61 = vrot.slane %v1614_v25, %v3637_v49  ;;  %v2713_v63 = vpop.f32.mrb[9].mxu1 }
 0xe33   : > { %v1626_v6 = vcombine.high %v1625_v61, %v1625_v61  ;;  %v1633_v11 = vrot.slane %v1625_v61, %v3637_v49 }
 0xe35   : > { %v1640_v17 = vrot.slane %v1626_v6, %v3637_v49  ;;  %v1641_v15 = vcombine.high %v1633_v11, %v1633_v11  ;;  %v1646_v23 = vrot.slane %v1633_v11, %v3640_v52 }
 0xe37   : > { %1659 = vrot.lane.b32.xlu1 %v1646_v23, %s3344_s18  ;;  %v1650_v29 = vrot.slane %v1640_v17, %v3640_v52  ;;  %v1654_v34 = vrot.slane %v1641_v15, %v3640_v52  ;;  %v1642_v18 = vcombine.high %v1640_v17, %v1640_v17 }
 0xe39   : > { %1661 = vrot.lane.b32.xlu0 %v1650_v29, %s3344_s18  ;;  %v1658_v21 = vrot.slane %v1642_v18, %v3640_v52 }
 0xe3b   : > { %1663 = vrot.lane.b32.xlu1 %v1654_v34, %s3344_s18 }
 0xe3f   : > { %1665 = vrot.lane.b32.xlu1 %v1658_v21, %s3344_s18 }
 0xea9   : > { %v1660_v5 = vpop.permute.xlu1 %1659 }
 0xeaa   : > { %v1671_v49 = vadd.f32 %v1660_v5, %v3653_v8  ;;  %v1672_v24 = vadd.f32 %v1660_v5, %v3657_v14 }
 0xeab   : > { %v1662_v7 = vpop.permute.xlu0 %1661 }
 0xeac   : > { %v1679_v27 = vmax.f32 %v1671_v49, 0.0  ;;  %v1680_v9 = vmax.f32 %v1672_v24, 0.0  ;;  %v1673_v30 = vadd.f32 %v1662_v7, %v3653_v8  ;;  %v1674_v13 = vadd.f32 %v1662_v7, %v3657_v14 }
 0xead   : > { %v1664_v16 = vpop.permute.xlu1 %1663 }
 0xeae   : > { %v1675_v19 = vadd.f32 %v1664_v16, %v3653_v8  ;;  %v1676_v20 = vadd.f32 %v1664_v16, %v3657_v14  ;;  %v1681_v52 = vmax.f32 %v1673_v30, 0.0  ;;  %v1682_v26 = vmax.f32 %v1674_v13, 0.0 }
 0xeaf   : > { %v1687_v28 = vmul.f32 %v1679_v27, %v3661_v22  ;;  %v1688_v31 = vmul.f32 %v1680_v9, %v3661_v22 }
 0xeb0   : > { %v1683_v35 = vmax.f32 %v1675_v19, 0.0  ;;  %v1684_v38 = vmax.f32 %v1676_v20, 0.0  ;;  %v1689_v46 = vmul.f32 %v1681_v52, %v3661_v22  ;;  %v1690_v47 = vmul.f32 %v1682_v26, %v3661_v22 }
 0xeb1   : > { %1703 = vrot.lane.b32.xlu0 %v1687_v28, %s3344_s18  ;;  %1705 = vrot.lane.b32.xlu1 %v1688_v31, %s3344_s18  ;;  %v1666_v33 = vpop.permute.xlu1 %1665 }
 0xeb2   : > { %v1677_v41 = vadd.f32 %v1666_v33, %v3653_v8  ;;  %v1678_v42 = vadd.f32 %v1666_v33, %v3657_v14  ;;  %v1691_v3 = vmul.f32 %v1683_v35, %v3661_v22  ;;  %v1692_v56 = vmul.f32 %v1684_v38, %v3661_v22 }
 0xeb4   : > { %v1685_v50 = vmax.f32 %v1677_v41, 0.0  ;;  %v1686_v54 = vmax.f32 %v1678_v42, 0.0 }
 0xeb5   : > { %1707 = vrot.lane.b32.xlu0 %v1689_v46, %s3344_s18  ;;  %1709 = vrot.lane.b32.xlu1 %v1690_v47, %s3344_s18 }
 0xeb6   : > { %v1694_v8 = vmul.f32 %v1686_v54, %v3661_v22  ;;  %v1693_v14 = vmul.f32 %v1685_v50, %v3661_v22 }
 0xeb9   : > { %1711 = vrot.lane.b32.xlu0 %v1691_v3, %s3344_s18  ;;  %1713 = vrot.lane.b32.xlu1 %v1692_v56, %s3344_s18 }
 0xebd   : > { %1717 = vrot.lane.b32.xlu1 %v1694_v8, %s3344_s18  ;;  %1715 = vrot.lane.b32.xlu0 %v1693_v14, %s3344_s18 }
 0xf23   : > { %v1704_v57 = vpop.permute.xlu0 %1703  ;;  %v1706_v36 = vpop.permute.xlu1 %1705 }
 0xf24   : > { %v1727_v59 = vsel %vm708_vm3, %v1704_v57, 0.0  ;;  %v1730_v60 = vsel %vm708_vm3, %v1706_v36, 0.0 }
 0xf25   : > { %1728 = vadd.xlane.f32.xlu0 %v1727_v59  ;;  %1731 = vadd.xlane.f32.xlu1 %v1730_v60 }
 0xf27   : > { %v1708_v12 = vpop.permute.xlu0 %1707  ;;  %v1710_v62 = vpop.permute.xlu1 %1709 }
 0xf28   : > { %v1733_v2 = vsel %vm708_vm3, %v1708_v12, 0.0  ;;  %v1736_v63 = vsel %vm708_vm3, %v1710_v62, 0.0 }
 0xf29   : > { %1734 = vadd.xlane.f32.xlu0 %v1733_v2 }
 0xf2b   : > { %v1712_v25 = vpop.permute.xlu0 %1711  ;;  %v1714_v61 = vpop.permute.xlu1 %1713 }
 0xf2c   : > { %v1739_v22 = vsel %vm708_vm3, %v1712_v25, 0.0  ;;  %v1742_v17 = vsel %vm708_vm3, %v1714_v61, 0.0 }
 0xf2d   : > { %1740 = vadd.xlane.f32.xlu1 %v1739_v22  ;;  %1737 = vadd.xlane.f32.xlu0 %v1736_v63 }
 0xf2f   : > { %v1716_v6 = vpop.permute.xlu0 %1715  ;;  %v1718_v15 = vpop.permute.xlu1 %1717 }
 0xf30   : > { %v1745_v11 = vsel %vm708_vm3, %v1716_v6, 0.0  ;;  %v1748_v23 = vsel %vm708_vm3, %v1718_v15, 0.0 }
 0xf31   : > { %1746 = vadd.xlane.f32.xlu1 %v1745_v11  ;;  %1743 = vadd.xlane.f32.xlu0 %v1742_v17 }
 0xf35   : > { %1749 = vadd.xlane.f32.xlu0 %v1748_v23 }
 0xfb2   : > { %v1729_v29 = vpop.xlane.xlu0 %1728  ;;  %v1732_v34 = vpop.xlane.xlu1 %1731 }
 0xfb3   : > { %v1762_v7 = vrot.slane %v1729_v29, %v3633_v43  ;;  %v1766_v27 = vrot.slane %v1732_v34, %v3635_v45 }
 0xfb5   : > { %v1767_v26 = vsel %vm752_vm4, %v1766_v27, %v1762_v7 }
 0xfb6   : > { %v1735_v18 = vpop.xlane.xlu0 %1734 }
 0xfb7   : > { %v1771_v9 = vrot.slane %v1735_v18, %v3633_v43 }
 0xfba   : > { %v1738_v21 = vpop.xlane.xlu0 %1737  ;;  %v1741_v5 = vpop.xlane.xlu1 %1740 }
 0xfbb   : > { %v1775_v49 = vrot.slane %v1738_v21, %v3635_v45  ;;  %v1780_v13 = vrot.slane %v1741_v5, %v3633_v43 }
 0xfbd   : > { %v1776_v19 = vsel %vm752_vm4, %v1775_v49, %v1771_v9 }
 0xfbe   : > { %v1744_v24 = vpop.xlane.xlu0 %1743  ;;  %v1747_v16 = vpop.xlane.xlu1 %1746  ;;  %v1795_v33 = vsel %vm781_vm5, %v1776_v19, %v1767_v26 }
 0xfbf   : > { %v1784_v30 = vrot.slane %v1744_v24, %v3635_v45  ;;  %v1789_v28 = vrot.slane %v1747_v16, %v3633_v43 }
 0xfc1   : > { %v1785_v20 = vsel %vm752_vm4, %v1784_v30, %v1780_v13 }
 0xfc2   : > { %v1750_v52 = vpop.xlane.xlu0 %1749  ;;  %v1796_v38 = vsel %vm783_vm6, %v1785_v20, %v1795_v33 }
 0xfc3   : > { %v1793_v31 = vrot.slane %v1750_v52, %v3635_v45 }
 0xfc5   : > { %v1794_v35 = vsel %vm752_vm4, %v1793_v31, %v1789_v28 }
 0xfc6   : > { %v1797_v41 = vsel %vm785_vm7, %v1794_v35, %v1796_v38 }
 0xfc7   : > { %v1799_v42 = vsel %vm520_vm8, %v1797_v41, -1e+30 }
 0xfc8   : > { %v1800_v46 = vsel %vm243_vm1, %v1799_v42, -inf }
 0xfc9   : > { %1801 = vmax.xlane.f32.xlu1 %v1800_v46 }
0x1056   : > { %v1802_v47 = vpop.xlane.xlu1 %1801 }
0x1057   : > { %v1803_v50 = vsub.f32 %v1799_v42, %v1802_v47 }
0x1059   : > { %v1804_v54 = vmul.f32 1.442695, %v1803_v50 }
0x105b   : > { %3166 = vpow2.f32 %v1804_v54 }
0x1065   : > { %v3167_v43 = vpop.eup %3166 }
0x1066   : > { %v1806_v45 = vsel %vm243_vm1, %v3167_v43, 0.0 }
0x1067   : > { %1807 = vadd.xlane.f32.xlu0 %v1806_v45 }
0x10f4   : > { %v1808_v3 = vpop.xlane.xlu0 %1807 }
0x10f5   : > { %3168 = vrcp.f32 %v1808_v3 }
0x10ff   : > { %v3169_v56 = vpop.eup %3168 }
0x1100   : > { %v1810_v8 = vmul.f32 %v3169_v56, %v3167_v43 }
0x1102   : > { %2719 = vmatmul.mubr.msk.f32.vlgmr.msra.gmra.mrb[14].mxu0 %vm247_vm2, %v1810_v8 }
0x1103   : > { %3037 = vmatpush3.bf16.msra.mxu0 %v3719_v32  ;;  %2753 = vmatprep.mubr.msk.f32.mxu0 %vm3342_vm0, %v3343_v1 }
0x1104   : > { %3038 = vmatprep.subr.bf16.mxu0 %v3341_v0 }
0x1107   : > { %3040 = vmatpush3.bf16.msra.mxu0 %v3723_v37 }
0x1108   : > { %3041 = vmatprep.subr.bf16.mxu0 %v3341_v0 }
0x110b   : > { %3043 = vmatpush3.bf16.msra.mxu0 %v3729_v40 }
0x110c   : > { %3044 = vmatprep.subr.bf16.mxu0 %v3341_v0 }
0x110f   : > { %3046 = vmatpush3.bf16.msra.mxu0 %v3733_v44 }
0x1110   : > { %3047 = vmatprep.subr.bf16.mxu0 %v3341_v0 }
0x1113   : > { %3049 = vmatpush3.bf16.msra.mxu0 %v3737_v48 }
0x1114   : > { %3050 = vmatprep.subr.bf16.mxu0 %v3341_v0 }
0x1117   : > { %3052 = vmatpush3.bf16.msra.mxu0 %v3741_v53 }
0x1118   : > { %3053 = vmatprep.subr.bf16.mxu0 %v3341_v0 }
0x111b   : > { %3055 = vmatpush3.bf16.msra.mxu0 %v3745_v55 }
0x111c   : > { %3056 = vmatprep.subr.bf16.mxu0 %v3341_v0 }
0x111f   : > { %3058 = vmatpush3.bf16.msra.mxu0 %v3749_v58 }
0x1122   : > { %2754 = vmatmul.mubr.f32.vlgmr.msra.gmra.mrb[16].mxu0 %v3943_v10 }
0x11d5   : > { %v1880_v1 = vpop.f32.mrb[14].mxu0 }
0x11d6   : > { %v2720_v4 = vpop.f32.mrb[15].mxu0 }
0x11f5   : > { %v1950_v32 = vpop.f32.mrb[16].mxu0 }
0x11f6   : > { %v1951_v37 = vadd.f32 %v1950_v32, %v1880_v1  ;;  %v2755_v40 = vpop.f32.mrb[17].mxu0 }
0x11f8   : > { %v1954_v44 = vadd.f32 %v3805_v39, %v1951_v37 }
0x11fa   : > { %v1955_v48 = vmax.f32 %v1954_v44, 0.0 }
0x11fc   : > { %2789 = vmatmul.mubr.f32.vlgmr.msra.gmra.mrb[10].mxu1 %v1955_v48 }
0x12cf   : > { %v2022_v53 = vpop.f32.mrb[10].mxu1 }
0x12d0   : > { %v2023_v55 = vadd.f32 %v3826_v51, %v2022_v53  ;;  %v2790_v0 = vpop.f32.mrb[11].mxu1 }
0x12d2   : > { %v2026_v14 = vmul.f32 %v2023_v55, %v2023_v55 }
0x12d4   : > { %v2027_v58 = vsel %vm1056_vm9, %v2026_v14, 0.0 }
0x12d5   : > { %2028 = vadd.xlane.f32.xlu1 %v2027_v58 }
0x1362   : > { %v2029_v10 = vpop.xlane.xlu1 %2028 }
0x1363   : > { %v2030_v57 = vmax.f32 %v2029_v10, 1e-24 }
0x1365   : > { %3170 = vrsqrt.f32 %v2030_v57 }
0x136f   : > { %v3171_v39 = vpop.eup %3170 }
0x1370   : > { %v2032_v36 = vmul.f32 %v3171_v39, %v2023_v55 }
0x1372   : > { %2033 = vst [vmem:[%s239_s30] sm:$0xf] %v2032_v36 }
0x1373   : > { %3273 = shalt.err (!%p3270_p6)
}
0x1374   : > { %s3274_s25 = scalar_lea.hbm %s4053_s28, 64  ;;  %s3278_s20 = scalar_lea.hbm %s4099_s3, 512 }
0x1375   : > { %p3275_p8 = scmp.ne.s32.totalorder %s4053_s28, %s3274_s25  ;;  %p3279_p4 = scmp.lt.u32.totalorder %s4053_s28, %s4099_s3 }
0x1376   : > { %p3280_p10 = scmp.lt.u32.totalorder %s3278_s20, %s3274_s25  ;;  %p3282_p3 = scmp.lt.u32.totalorder %s3274_s25, %s4053_s28 }
0x1377   : > { %p3276_p11 = pnand %p3275_p8, %p3453_p12 }
0x1378   : > { %p3281_p13 = por %p3280_p10, %p3279_p4 }
0x1379   : > { %p3277_p0 = pneg %p3276_p11 }
0x137a   : > { %p3283_p7 = por %p3282_p3, %p3281_p13 }
0x137c   : > { %p3284_p9 = pnand %p3283_p7, %p3277_p0 }
0x137e   : > { %3287 = shalt.err (!%p3284_p9)
}
0x137f   : > { %3091 = dma.vmem_to_hbm [thread:$0]  (%p3453_p12), %s4055_s5, 64, %s4053_s28, %s2035_s22  }
0x1380 PF: > { %p3111_p1 = scmp.ge.s32.totalorder %s3334_s15, 2  ;;  %s2060_s10 = sand.u32 1, %s3322_s12  }
0x1381   : > { %p4116_p5 = scmp.ne.s32.totalorder %s4105_s19, 0  ;;  %s2061_s18 = scalar_lea.sflag [#allocation4], %s2060_s10 }
0x1383   : > { %p3105_p2 = pnand %p3111_p1, %p4116_p5 }
0x1385   : > { %3317 = dma.done.wait (!%p3105_p2), %s2061_s18, 64  }
0x1386   : > { %3319 = vsyncadd (!%p3105_p2), %s2061_s18, 4294967232  ;;  %p19_p6 = scmp.ge.s32.totalorder %s3420_s24, 10   ;;  %s4117_s12 = smov %s3326_s13 }
0x1387   : > { %s4118_s13 = smov %s3330_s14  ;;  %s4119_s14 = smov %s3449_s17 }
0x1388   : > { %s4120_s15 = smov %s3420_s24  ;;  %21 = sbr.rel (!%p19_p6) target bundleno = 7 (0x7), region = 94 }
0x138f   :  { %2066 = vsyncpa [#allocation3], 1 }
0x1390   :  { %2068 = vsyncpa [#allocation3 + $0x1], 1 }
0x1391   :  { %2069 = vsyncpa [#allocation6], 1 }
0x1392   :  { %2071 = vsyncpa [#allocation6 + $0x1], 1 }
0x1393   :  { %2072 = vsyncpa [#allocation4], 1 }
0x1394   :  { %2074 = vsyncpa [#allocation4 + $0x1], 1 }

</bundles_post_ra>
